<compile_context>
chip_gen: v6e
topology: v6e:2x2x1
jax: 0.10.0
libtpu: 0.0.40
codegen_flags: <defaults>
</compile_context>

<pallas_src>
import functools
import math

import jax
import jax.numpy as jnp
from jax.experimental import pallas as pl
from jax.experimental.pallas import tpu as pltpu  # noqa: F401  (TPU backend)


# ----------------------------- configuration ------------------------------- #
B          = 2      # batch
N_VARS     = 2      # ECG channels
SEQ_LEN    = 32
PATCH_LEN  = 16
STRIDE     = 8
PATCH_NUMS = (SEQ_LEN - PATCH_LEN) // STRIDE + 2      # 4
D_MODEL    = 32
N_HEADS    = 4
D_FF       = 16                                       # d_keys in ReprogrammingLayer
HE         = D_FF * N_HEADS                           # 64
D_LLM      = 128
VOCAB      = 256
NUM_TOKENS = 64
TOP_K      = 5


# ------------------------------ Pallas kernel ------------------------------ #
def _fused_kernel(we_ref, map_w_ref, map_b_ref,
                  patches_ref, patch_wt_ref, patch_b_ref,
                  wq_t_ref, bq_ref, wkv_t_ref, bkv_ref,
                  wo_t_ref, bo_ref, rsel_ref, score_ref,
                  src_ref, enc_ref, sim_ref, loss_ref,
                  *, n_heads, d_keys, patch_nums, b0):
    f32 = jnp.float32
    contract_last = (((1,), (1,)), ((), ()))

    # ---- mapping_layer: source_embeddings = map_w @ W_emb + b (lane-dense) --
    src = jnp.dot(map_w_ref[...], we_ref[...],
                  preferred_element_type=f32) + map_b_ref[...]        # (T_tok, d_llm)
    src_ref[...] = src

    # ---- patch-embedding linear: (Bf*L, patch_len) @ (patch_len, d_model) ---
    enc = jnp.dot(patches_ref[...], patch_wt_ref[...],
                  preferred_element_type=f32) + patch_b_ref[...]      # (Bf*L, d_model)

    # ---- reprogramming layer (batch collapsed; K/V shared across batch) -----
    q = jnp.dot(enc, wq_t_ref[...],
                preferred_element_type=f32) + bq_ref[...]             # (Bf*L, H*E)
    kv = jnp.dot(src, wkv_t_ref[...],
                 preferred_element_type=f32) + bkv_ref[...]           # (S, 2*H*E)

    he = n_heads * d_keys
    scale = 1.0 / math.sqrt(d_keys)
    wo_t = wo_t_ref[...]                                              # (H*E, d_llm)
    acc = jnp.zeros((q.shape[0], wo_t.shape[1]), f32)                 # (Bf*L, d_llm)

    for h in range(n_heads):                                          # static unroll
        lo = h * d_keys
        qh = q[:, lo:lo + d_keys]                                     # (Bf*L, E)
        kh = kv[:, lo:lo + d_keys]                                    # (S, E)
        vh = kv[:, he + lo:he + lo + d_keys]                          # (S, E)
        s = jax.lax.dot_general(qh, kh, contract_last,
                                preferred_element_type=f32) * scale   # (Bf*L, S)
        s = s - jnp.max(s, axis=-1, keepdims=True)
        p = jnp.exp(s)
        p = p * pl.reciprocal(jnp.sum(p, axis=-1, keepdims=True), approx=True)
        oh = jnp.dot(p, vh, preferred_element_type=f32)               # (Bf*L, E)
        acc = acc + jnp.dot(oh, wo_t[lo:lo + d_keys, :],
                            preferred_element_type=f32)               # per-head proj

    enc_out = acc + bo_ref[...]                                       # (Bf*L, d_llm)
    enc_ref[...] = enc_out

    # ---- in-batch contrastive similarity loss (fused, no reshapes) ----------
    # flattened_ts gram expressed as  sum_p (R_p @ enc_out) @ (R_p @ enc_out)^T
    sim_un = jnp.zeros((b0, b0), f32)
    for p_idx in range(patch_nums):                                   # static unroll
        ep = jnp.dot(rsel_ref[p_idx], enc_out,
                     preferred_element_type=f32)                      # (b0, d_llm)
        sim_un = sim_un + jax.lax.dot_general(ep, ep, contract_last,
                                              preferred_element_type=f32)

    ri = jax.lax.broadcasted_iota(jnp.int32, (b0, b0), 0)
    ci = jax.lax.broadcasted_iota(jnp.int32, (b0, b0), 1)
    eye = (ri == ci).astype(f32)
    nsq_col = jnp.sum(sim_un * eye, axis=1, keepdims=True)            # ||x_i||^2, (b0,1)
    nsq_row = jnp.sum(sim_un * eye, axis=0, keepdims=True)            # (1,b0)
    sim = sim_un * jax.lax.rsqrt(nsq_col) * jax.lax.rsqrt(nsq_row)    # cosine sim
    sim_ref[...] = sim

    d = sim - score_ref[...].astype(f32)
    d2 = d * d
    s = jnp.sum(d2, axis=1, keepdims=True)
    s = jnp.sum(s, axis=0, keepdims=True)
    loss_ref[...] = s * (1.0 / float(b0 * b0))                        # MSE mean


def fused_forward(params, patches, rsel, score_bf16):
    """Single launch: mapping + patch linear + reprogramming attn + CL loss."""
    bf_l = patches.shape[0]
    b0 = score_bf16.shape[0]
    kernel = functools.partial(_fused_kernel, n_heads=N_HEADS, d_keys=D_FF,
                               patch_nums=PATCH_NUMS, b0=b0)
    return pl.pallas_call(
        kernel,
        out_shape=(
            jax.ShapeDtypeStruct((NUM_TOKENS, D_LLM), jnp.float32),   # source emb.
            jax.ShapeDtypeStruct((bf_l, D_LLM), jnp.float32),         # enc_out flat
            jax.ShapeDtypeStruct((b0, b0), jnp.float32),              # similarity
            jax.ShapeDtypeStruct((1, 1), jnp.float32),                # loss_sim
        ),
    )(
        params["word_embeddings"], params["map_w"], params["map_b"],
        patches, params["patch_wt"], params["patch_b"],
        params["rep_wq_t"], params["rep_bq"],
        params["rep_wkv_t"], params["rep_bkv"],
        params["rep_wo_t"], params["rep_bo"],
        rsel, score_bf16,
    )


# ------------------------------- plain-JAX glue ----------------------------- #
def calcute_lags(x_flat, top_k=TOP_K):
    # TODO(synk): FFT has no Pallas TPU primitive; computed with jnp.fft (XLA FFT).
    x = x_flat[:, None, :]
    q = jnp.fft.rfft(x, axis=-1)
    res = q * jnp.conj(q)
    corr = jnp.fft.irfft(res, n=x.shape[-1], axis=-1)
    mean_value = jnp.mean(corr, axis=1)                               # (BN, T)
    _, lags = jax.lax.top_k(mean_value, top_k)
    return lags


def _unfold_patches(x_enc):
    """(B, n_vars, T) -> (B*n_vars*patch_nums, patch_len)  (index shuffling only)."""
    bb, nv, _ = x_enc.shape
    pad_tail = jnp.repeat(x_enc[:, :, -1:], STRIDE, axis=-1)          # replication pad
    xp = jnp.concatenate([x_enc, pad_tail], axis=-1)
    starts = jnp.arange(PATCH_NUMS) * STRIDE
    idx = starts[:, None] + jnp.arange(PATCH_LEN)[None, :]            # (P, patch_len)
    patches = xp[:, :, idx]                                           # (B, N, P, pl)
    return patches.reshape(bb * nv * PATCH_NUMS, PATCH_LEN).astype(jnp.float32)


@jax.jit
def forward(params, batch_ecg_data, batch_score):
    # ---- patching (glue) -----------------------------------------------------
    x_enc = jnp.transpose(batch_ecg_data, (0, 2, 1))                  # (B, n_vars, T)
    bb, nv, t = x_enc.shape
    b0 = bb * nv
    patches = _unfold_patches(x_enc)

    # row-selection constants for the fused CL loss (constant-folded by XLA):
    # rsel[p, i, r] = 1  iff  r == i*PATCH_NUMS + p
    rsel = (jnp.arange(b0 * PATCH_NUMS)[None, None, :] ==
            (jnp.arange(b0)[None, :, None] * PATCH_NUMS
             + jnp.arange(PATCH_NUMS)[:, None, None])).astype(jnp.float32)
    score_bf16 = batch_score.astype(jnp.bfloat16)                     # match torch .to(bf16)

    # ---- single launch: mapping + patch linear + reprogramming + CL loss -----
    source_embeddings, enc_flat, sim, loss_sim = fused_forward(
        params, patches, rsel, score_bf16)
    enc_out = enc_flat.reshape(b0, PATCH_NUMS, D_LLM)

    # ---- per-series prompt statistics (plain JAX; feed string prompts only) ---
    x_flat = x_enc.reshape(b0, t).astype(jnp.float32)
    mins = jnp.min(x_flat, axis=-1)
    maxs = jnp.max(x_flat, axis=-1)
    trends = x_flat[:, -1] - x_flat[:, 0]                             # diff(...).sum()
    medians = jnp.sort(x_flat, axis=1)[:, (t - 1) // 2]               # torch lower median
    lags = calcute_lags(x_flat)

    # TODO(synk): prompt construction, tokenization and the HF causal-LM
    #             forward/loss are untranslatable to Pallas and omitted.
    return {
        "source_embeddings": source_embeddings,
        "enc_out": enc_out,
        "stats_min_max_trend": jnp.stack([mins, maxs, trends], axis=-1),
        "medians": medians,
        "lags": lags,
        "similarity_matrix": sim,
        "loss_sim": loss_sim[0, 0],
    }


# ------------------------------ parameter init ------------------------------ #
def _linear_init(key, out_features, in_features):
    kw, kb = jax.random.split(key)
    bound = 1.0 / math.sqrt(in_features)
    w = jax.random.uniform(kw, (out_features, in_features), jnp.float32, -bound, bound)
    b = jax.random.uniform(kb, (out_features,), jnp.float32, -bound, bound)
    return w, b


def init_params(key):
    keys = jax.random.split(key, 8)
    we = jax.random.normal(keys[0], (VOCAB, D_LLM), jnp.float32) * 0.02
    map_w, map_b = _linear_init(keys[1], NUM_TOKENS, VOCAB)
    patch_w, patch_b = _linear_init(keys[2], D_MODEL, PATCH_LEN)
    wq, bq = _linear_init(keys[3], HE, D_MODEL)
    wk, bk = _linear_init(keys[4], HE, D_LLM)
    wv, bv = _linear_init(keys[5], HE, D_LLM)
    wo, bo = _linear_init(keys[6], D_LLM, HE)
    return {
        # bf16 operands for the first MXU stage (halved DMA; bf16 MXU on v6e/v7x)
        "word_embeddings": we.astype(jnp.bfloat16),                   # (V, d_llm)
        "map_w": map_w.astype(jnp.bfloat16),                          # (tokens, V)
        "map_b": map_b.reshape(NUM_TOKENS, 1),                        # (tokens, 1)
        # pre-transposed fp32 weights, done once at init
        "patch_wt": jnp.transpose(patch_w),                           # (patch_len, d_model)
        "patch_b": patch_b.reshape(1, D_MODEL),
        "rep_wq_t": jnp.transpose(wq),                                # (d_model, H*E)
        "rep_bq": bq.reshape(1, HE),
        "rep_wkv_t": jnp.concatenate([jnp.transpose(wk),
                                      jnp.transpose(wv)], axis=1),    # (d_llm, 2*H*E)
        "rep_bkv": jnp.concatenate([bk, bv]).reshape(1, 2 * HE),
        "rep_wo_t": jnp.transpose(wo),                                # (H*E, d_llm)
        "rep_bo": bo.reshape(1, D_LLM),
    }


# ----------------------------------- main ----------------------------------- #
if __name__ == "__main__":
    root = jax.random.PRNGKey(0)
    k_param, k_data, k_score = jax.random.split(root, 3)

    params = init_params(k_param)
    batch_ecg_data = jax.random.normal(k_data, (B, SEQ_LEN, N_VARS), jnp.float32)
    b0 = B * N_VARS
    batch_score = jax.random.uniform(k_score, (b0, b0), jnp.float32)

    out = forward(params, batch_ecg_data, batch_score)
    jax.block_until_ready(out)
    print("KERNEL_OK")
</pallas_src>

<mosaic_0001>
module attributes {stable_mosaic.version = 11 : i64} {
  func.func @_fused_kernel(%arg0: memref<256x128xbf16, #tpu.memory_space<vmem>>, %arg1: memref<64x256xbf16, #tpu.memory_space<vmem>>, %arg2: memref<64x1xf32, #tpu.memory_space<vmem>>, %arg3: memref<16x16xf32, #tpu.memory_space<vmem>>, %arg4: memref<16x32xf32, #tpu.memory_space<vmem>>, %arg5: memref<1x32xf32, #tpu.memory_space<vmem>>, %arg6: memref<32x64xf32, #tpu.memory_space<vmem>>, %arg7: memref<1x64xf32, #tpu.memory_space<vmem>>, %arg8: memref<128x128xf32, #tpu.memory_space<vmem>>, %arg9: memref<1x128xf32, #tpu.memory_space<vmem>>, %arg10: memref<64x128xf32, #tpu.memory_space<vmem>>, %arg11: memref<1x128xf32, #tpu.memory_space<vmem>>, %arg12: memref<4x4x16xf32, #tpu.memory_space<vmem>>, %arg13: memref<4x4xbf16, #tpu.memory_space<vmem>>, %arg14: memref<64x128xf32, #tpu.memory_space<vmem>>, %arg15: memref<16x128xf32, #tpu.memory_space<vmem>>, %arg16: memref<4x4xf32, #tpu.memory_space<vmem>>, %arg17: memref<1x1xf32, #tpu.memory_space<vmem>>) attributes {dimension_semantics = [], scalar_prefetch = 0 : i64, scratch_operands = 0 : i64, tpu.core_type = #tpu.core_type<tc>} {
    %c0 = arith.constant 0 : index
    %c0_0 = arith.constant 0 : index
    %0 = vector.load %arg1[%c0, %c0_0] : memref<64x256xbf16, #tpu.memory_space<vmem>>, vector<64x256xbf16>
    %c0_1 = arith.constant 0 : index
    %c0_2 = arith.constant 0 : index
    %1 = vector.load %arg0[%c0_1, %c0_2] : memref<256x128xbf16, #tpu.memory_space<vmem>>, vector<256x128xbf16>
    %cst = arith.constant dense<0.000000e+00> : vector<64x128xf32>
    %2 = tpu.matmul %0, %1, %cst {dimension_numbers = #tpu.dot_dimension_numbers<[1], [0], [0], [1], [0, 0, 1, 1], [], []>} : vector<64x256xbf16>, vector<256x128xbf16>, vector<64x128xf32> -> vector<64x128xf32>
    %c0_3 = arith.constant 0 : index
    %c0_4 = arith.constant 0 : index
    %3 = vector.load %arg2[%c0_3, %c0_4] : memref<64x1xf32, #tpu.memory_space<vmem>>, vector<64x1xf32>
    %4 = vector.broadcast %3 : vector<64x1xf32> to vector<64x128xf32>
    %5 = arith.addf %2, %4 : vector<64x128xf32>
    %c0_5 = arith.constant 0 : index
    %c0_6 = arith.constant 0 : index
    %6 = vector.load %arg14[%c0_5, %c0_6] : memref<64x128xf32, #tpu.memory_space<vmem>>, vector<64x128xf32>
    tpu.vector_store %arg14[%c0_5, %c0_6], %5 {strides = array<i32>} : memref<64x128xf32, #tpu.memory_space<vmem>>, vector<64x128xf32>,
    %c0_7 = arith.constant 0 : index
    %c0_8 = arith.constant 0 : index
    %7 = vector.load %arg3[%c0_7, %c0_8] : memref<16x16xf32, #tpu.memory_space<vmem>>, vector<16x16xf32>
    %c0_9 = arith.constant 0 : index
    %c0_10 = arith.constant 0 : index
    %8 = vector.load %arg4[%c0_9, %c0_10] : memref<16x32xf32, #tpu.memory_space<vmem>>, vector<16x32xf32>
    %cst_11 = arith.constant dense<0.000000e+00> : vector<16x32xf32>
    %9 = tpu.matmul %7, %8, %cst_11 {dimension_numbers = #tpu.dot_dimension_numbers<[1], [0], [0], [1], [0, 0, 1, 1], [], []>} : vector<16x16xf32>, vector<16x32xf32>, vector<16x32xf32> -> vector<16x32xf32>
    %c0_12 = arith.constant 0 : index
    %c0_13 = arith.constant 0 : index
    %10 = vector.load %arg5[%c0_12, %c0_13] : memref<1x32xf32, #tpu.memory_space<vmem>>, vector<1x32xf32>
    %11 = vector.broadcast %10 : vector<1x32xf32> to vector<16x32xf32>
    %12 = arith.addf %9, %11 : vector<16x32xf32>
    %c0_14 = arith.constant 0 : index
    %c0_15 = arith.constant 0 : index
    %13 = vector.load %arg6[%c0_14, %c0_15] : memref<32x64xf32, #tpu.memory_space<vmem>>, vector<32x64xf32>
    %cst_16 = arith.constant dense<0.000000e+00> : vector<16x64xf32>
    %14 = tpu.matmul %12, %13, %cst_16 {dimension_numbers = #tpu.dot_dimension_numbers<[1], [0], [0], [1], [0, 0, 1, 1], [], []>} : vector<16x32xf32>, vector<32x64xf32>, vector<16x64xf32> -> vector<16x64xf32>
    %c0_17 = arith.constant 0 : index
    %c0_18 = arith.constant 0 : index
    %15 = vector.load %arg7[%c0_17, %c0_18] : memref<1x64xf32, #tpu.memory_space<vmem>>, vector<1x64xf32>
    %16 = vector.broadcast %15 : vector<1x64xf32> to vector<16x64xf32>
    %17 = arith.addf %14, %16 : vector<16x64xf32>
    %c0_19 = arith.constant 0 : index
    %c0_20 = arith.constant 0 : index
    %18 = vector.load %arg8[%c0_19, %c0_20] : memref<128x128xf32, #tpu.memory_space<vmem>>, vector<128x128xf32>
    %cst_21 = arith.constant dense<0.000000e+00> : vector<64x128xf32>
    %19 = tpu.matmul %5, %18, %cst_21 {dimension_numbers = #tpu.dot_dimension_numbers<[1], [0], [0], [1], [0, 0, 1, 1], [], []>} : vector<64x128xf32>, vector<128x128xf32>, vector<64x128xf32> -> vector<64x128xf32>
    %c0_22 = arith.constant 0 : index
    %c0_23 = arith.constant 0 : index
    %20 = vector.load %arg9[%c0_22, %c0_23] : memref<1x128xf32, #tpu.memory_space<vmem>>, vector<1x128xf32>
    %21 = vector.broadcast %20 : vector<1x128xf32> to vector<64x128xf32>
    %22 = arith.addf %19, %21 : vector<64x128xf32>
    %c0_24 = arith.constant 0 : index
    %c0_25 = arith.constant 0 : index
    %23 = vector.load %arg10[%c0_24, %c0_25] : memref<64x128xf32, #tpu.memory_space<vmem>>, vector<64x128xf32>
    %cst_26 = arith.constant 0.000000e+00 : f32
    %24 = vector.broadcast %cst_26 : f32 to vector<16x128xf32>
    %25 = vector.extract_strided_slice %17 {offsets = [0, 0], sizes = [16, 16], strides = [1, 1]} : vector<16x64xf32> to vector<16x16xf32>
    %26 = vector.extract_strided_slice %22 {offsets = [0, 0], sizes = [64, 16], strides = [1, 1]} : vector<64x128xf32> to vector<64x16xf32>
    %27 = vector.extract_strided_slice %22 {offsets = [0, 64], sizes = [64, 16], strides = [1, 1]} : vector<64x128xf32> to vector<64x16xf32>
    %cst_27 = arith.constant dense<0.000000e+00> : vector<16x64xf32>
    %28 = tpu.matmul %25, %26, %cst_27 {dimension_numbers = #tpu.dot_dimension_numbers<[1], [1], [0], [0], [0, 0, 1, 0], [], []>} : vector<16x16xf32>, vector<64x16xf32>, vector<16x64xf32> -> vector<16x64xf32>
    %cst_28 = arith.constant 2.500000e-01 : f32
    %29 = vector.broadcast %cst_28 : f32 to vector<16x64xf32>
    %30 = arith.mulf %28, %29 : vector<16x64xf32>
    %cst_29 = arith.constant dense<0xFF800000> : vector<16xf32>
    %31 = vector.multi_reduction <maximumf>, %30, %cst_29 [1] : vector<16x64xf32> to vector<16xf32>
    %32 = vector.shape_cast %31 : vector<16xf32> to vector<16x1xf32>
    %33 = vector.broadcast %32 : vector<16x1xf32> to vector<16x64xf32>
    %34 = arith.subf %30, %33 : vector<16x64xf32>
    %35 = math.exp %34 : vector<16x64xf32>
    %cst_30 = arith.constant dense<0.000000e+00> : vector<16xf32>
    %36 = vector.multi_reduction <add>, %35, %cst_30 [1] : vector<16x64xf32> to vector<16xf32>
    %37 = vector.shape_cast %36 : vector<16xf32> to vector<16x1xf32>
    %38 = tpu.reciprocal %37 {approx = true} : vector<16x1xf32> -> vector<16x1xf32>
    %39 = vector.broadcast %38 : vector<16x1xf32> to vector<16x64xf32>
    %40 = arith.mulf %35, %39 : vector<16x64xf32>
    %cst_31 = arith.constant dense<0.000000e+00> : vector<16x16xf32>
    %41 = tpu.matmul %40, %27, %cst_31 {dimension_numbers = #tpu.dot_dimension_numbers<[1], [0], [0], [1], [0, 0, 1, 1], [], []>} : vector<16x64xf32>, vector<64x16xf32>, vector<16x16xf32> -> vector<16x16xf32>
    %42 = vector.extract_strided_slice %23 {offsets = [0, 0], sizes = [16, 128], strides = [1, 1]} : vector<64x128xf32> to vector<16x128xf32>
    %cst_32 = arith.constant dense<0.000000e+00> : vector<16x128xf32>
    %43 = tpu.matmul %41, %42, %cst_32 {dimension_numbers = #tpu.dot_dimension_numbers<[1], [0], [0], [1], [0, 0, 1, 1], [], []>} : vector<16x16xf32>, vector<16x128xf32>, vector<16x128xf32> -> vector<16x128xf32>
    %44 = arith.addf %24, %43 : vector<16x128xf32>
    %45 = vector.extract_strided_slice %17 {offsets = [0, 16], sizes = [16, 16], strides = [1, 1]} : vector<16x64xf32> to vector<16x16xf32>
    %46 = vector.extract_strided_slice %22 {offsets = [0, 16], sizes = [64, 16], strides = [1, 1]} : vector<64x128xf32> to vector<64x16xf32>
    %47 = vector.extract_strided_slice %22 {offsets = [0, 80], sizes = [64, 16], strides = [1, 1]} : vector<64x128xf32> to vector<64x16xf32>
    %cst_33 = arith.constant dense<0.000000e+00> : vector<16x64xf32>
    %48 = tpu.matmul %45, %46, %cst_33 {dimension_numbers = #tpu.dot_dimension_numbers<[1], [1], [0], [0], [0, 0, 1, 0], [], []>} : vector<16x16xf32>, vector<64x16xf32>, vector<16x64xf32> -> vector<16x64xf32>
    %cst_34 = arith.constant 2.500000e-01 : f32
    %49 = vector.broadcast %cst_34 : f32 to vector<16x64xf32>
    %50 = arith.mulf %48, %49 : vector<16x64xf32>
    %cst_35 = arith.constant dense<0xFF800000> : vector<16xf32>
    %51 = vector.multi_reduction <maximumf>, %50, %cst_35 [1] : vector<16x64xf32> to vector<16xf32>
    %52 = vector.shape_cast %51 : vector<16xf32> to vector<16x1xf32>
    %53 = vector.broadcast %52 : vector<16x1xf32> to vector<16x64xf32>
    %54 = arith.subf %50, %53 : vector<16x64xf32>
    %55 = math.exp %54 : vector<16x64xf32>
    %cst_36 = arith.constant dense<0.000000e+00> : vector<16xf32>
    %56 = vector.multi_reduction <add>, %55, %cst_36 [1] : vector<16x64xf32> to vector<16xf32>
    %57 = vector.shape_cast %56 : vector<16xf32> to vector<16x1xf32>
    %58 = tpu.reciprocal %57 {approx = true} : vector<16x1xf32> -> vector<16x1xf32>
    %59 = vector.broadcast %58 : vector<16x1xf32> to vector<16x64xf32>
    %60 = arith.mulf %55, %59 : vector<16x64xf32>
    %cst_37 = arith.constant dense<0.000000e+00> : vector<16x16xf32>
    %61 = tpu.matmul %60, %47, %cst_37 {dimension_numbers = #tpu.dot_dimension_numbers<[1], [0], [0], [1], [0, 0, 1, 1], [], []>} : vector<16x64xf32>, vector<64x16xf32>, vector<16x16xf32> -> vector<16x16xf32>
    %62 = vector.extract_strided_slice %23 {offsets = [16, 0], sizes = [16, 128], strides = [1, 1]} : vector<64x128xf32> to vector<16x128xf32>
    %cst_38 = arith.constant dense<0.000000e+00> : vector<16x128xf32>
    %63 = tpu.matmul %61, %62, %cst_38 {dimension_numbers = #tpu.dot_dimension_numbers<[1], [0], [0], [1], [0, 0, 1, 1], [], []>} : vector<16x16xf32>, vector<16x128xf32>, vector<16x128xf32> -> vector<16x128xf32>
    %64 = arith.addf %44, %63 : vector<16x128xf32>
    %65 = vector.extract_strided_slice %17 {offsets = [0, 32], sizes = [16, 16], strides = [1, 1]} : vector<16x64xf32> to vector<16x16xf32>
    %66 = vector.extract_strided_slice %22 {offsets = [0, 32], sizes = [64, 16], strides = [1, 1]} : vector<64x128xf32> to vector<64x16xf32>
    %67 = vector.extract_strided_slice %22 {offsets = [0, 96], sizes = [64, 16], strides = [1, 1]} : vector<64x128xf32> to vector<64x16xf32>
    %cst_39 = arith.constant dense<0.000000e+00> : vector<16x64xf32>
    %68 = tpu.matmul %65, %66, %cst_39 {dimension_numbers = #tpu.dot_dimension_numbers<[1], [1], [0], [0], [0, 0, 1, 0], [], []>} : vector<16x16xf32>, vector<64x16xf32>, vector<16x64xf32> -> vector<16x64xf32>
    %cst_40 = arith.constant 2.500000e-01 : f32
    %69 = vector.broadcast %cst_40 : f32 to vector<16x64xf32>
    %70 = arith.mulf %68, %69 : vector<16x64xf32>
    %cst_41 = arith.constant dense<0xFF800000> : vector<16xf32>
    %71 = vector.multi_reduction <maximumf>, %70, %cst_41 [1] : vector<16x64xf32> to vector<16xf32>
    %72 = vector.shape_cast %71 : vector<16xf32> to vector<16x1xf32>
    %73 = vector.broadcast %72 : vector<16x1xf32> to vector<16x64xf32>
    %74 = arith.subf %70, %73 : vector<16x64xf32>
    %75 = math.exp %74 : vector<16x64xf32>
    %cst_42 = arith.constant dense<0.000000e+00> : vector<16xf32>
    %76 = vector.multi_reduction <add>, %75, %cst_42 [1] : vector<16x64xf32> to vector<16xf32>
    %77 = vector.shape_cast %76 : vector<16xf32> to vector<16x1xf32>
    %78 = tpu.reciprocal %77 {approx = true} : vector<16x1xf32> -> vector<16x1xf32>
    %79 = vector.broadcast %78 : vector<16x1xf32> to vector<16x64xf32>
    %80 = arith.mulf %75, %79 : vector<16x64xf32>
    %cst_43 = arith.constant dense<0.000000e+00> : vector<16x16xf32>
    %81 = tpu.matmul %80, %67, %cst_43 {dimension_numbers = #tpu.dot_dimension_numbers<[1], [0], [0], [1], [0, 0, 1, 1], [], []>} : vector<16x64xf32>, vector<64x16xf32>, vector<16x16xf32> -> vector<16x16xf32>
    %82 = vector.extract_strided_slice %23 {offsets = [32, 0], sizes = [16, 128], strides = [1, 1]} : vector<64x128xf32> to vector<16x128xf32>
    %cst_44 = arith.constant dense<0.000000e+00> : vector<16x128xf32>
    %83 = tpu.matmul %81, %82, %cst_44 {dimension_numbers = #tpu.dot_dimension_numbers<[1], [0], [0], [1], [0, 0, 1, 1], [], []>} : vector<16x16xf32>, vector<16x128xf32>, vector<16x128xf32> -> vector<16x128xf32>
    %84 = arith.addf %64, %83 : vector<16x128xf32>
    %85 = vector.extract_strided_slice %17 {offsets = [0, 48], sizes = [16, 16], strides = [1, 1]} : vector<16x64xf32> to vector<16x16xf32>
    %86 = vector.extract_strided_slice %22 {offsets = [0, 48], sizes = [64, 16], strides = [1, 1]} : vector<64x128xf32> to vector<64x16xf32>
    %87 = vector.extract_strided_slice %22 {offsets = [0, 112], sizes = [64, 16], strides = [1, 1]} : vector<64x128xf32> to vector<64x16xf32>
    %cst_45 = arith.constant dense<0.000000e+00> : vector<16x64xf32>
    %88 = tpu.matmul %85, %86, %cst_45 {dimension_numbers = #tpu.dot_dimension_numbers<[1], [1], [0], [0], [0, 0, 1, 0], [], []>} : vector<16x16xf32>, vector<64x16xf32>, vector<16x64xf32> -> vector<16x64xf32>
    %cst_46 = arith.constant 2.500000e-01 : f32
    %89 = vector.broadcast %cst_46 : f32 to vector<16x64xf32>
    %90 = arith.mulf %88, %89 : vector<16x64xf32>
    %cst_47 = arith.constant dense<0xFF800000> : vector<16xf32>
    %91 = vector.multi_reduction <maximumf>, %90, %cst_47 [1] : vector<16x64xf32> to vector<16xf32>
    %92 = vector.shape_cast %91 : vector<16xf32> to vector<16x1xf32>
    %93 = vector.broadcast %92 : vector<16x1xf32> to vector<16x64xf32>
    %94 = arith.subf %90, %93 : vector<16x64xf32>
    %95 = math.exp %94 : vector<16x64xf32>
    %cst_48 = arith.constant dense<0.000000e+00> : vector<16xf32>
    %96 = vector.multi_reduction <add>, %95, %cst_48 [1] : vector<16x64xf32> to vector<16xf32>
    %97 = vector.shape_cast %96 : vector<16xf32> to vector<16x1xf32>
    %98 = tpu.reciprocal %97 {approx = true} : vector<16x1xf32> -> vector<16x1xf32>
    %99 = vector.broadcast %98 : vector<16x1xf32> to vector<16x64xf32>
    %100 = arith.mulf %95, %99 : vector<16x64xf32>
    %cst_49 = arith.constant dense<0.000000e+00> : vector<16x16xf32>
    %101 = tpu.matmul %100, %87, %cst_49 {dimension_numbers = #tpu.dot_dimension_numbers<[1], [0], [0], [1], [0, 0, 1, 1], [], []>} : vector<16x64xf32>, vector<64x16xf32>, vector<16x16xf32> -> vector<16x16xf32>
    %102 = vector.extract_strided_slice %23 {offsets = [48, 0], sizes = [16, 128], strides = [1, 1]} : vector<64x128xf32> to vector<16x128xf32>
    %cst_50 = arith.constant dense<0.000000e+00> : vector<16x128xf32>
    %103 = tpu.matmul %101, %102, %cst_50 {dimension_numbers = #tpu.dot_dimension_numbers<[1], [0], [0], [1], [0, 0, 1, 1], [], []>} : vector<16x16xf32>, vector<16x128xf32>, vector<16x128xf32> -> vector<16x128xf32>
    %104 = arith.addf %84, %103 : vector<16x128xf32>
    %c0_51 = arith.constant 0 : index
    %c0_52 = arith.constant 0 : index
    %105 = vector.load %arg11[%c0_51, %c0_52] : memref<1x128xf32, #tpu.memory_space<vmem>>, vector<1x128xf32>
    %106 = vector.broadcast %105 : vector<1x128xf32> to vector<16x128xf32>
    %107 = arith.addf %104, %106 : vector<16x128xf32>
    %c0_53 = arith.constant 0 : index
    %c0_54 = arith.constant 0 : index
    %108 = vector.load %arg15[%c0_53, %c0_54] : memref<16x128xf32, #tpu.memory_space<vmem>>, vector<16x128xf32>
    tpu.vector_store %arg15[%c0_53, %c0_54], %107 {strides = array<i32>} : memref<16x128xf32, #tpu.memory_space<vmem>>, vector<16x128xf32>,
    %cst_55 = arith.constant 0.000000e+00 : f32
    %109 = vector.broadcast %cst_55 : f32 to vector<4x4xf32>
    %c0_56 = arith.constant 0 : index
    %c0_57 = arith.constant 0 : index
    %c0_58 = arith.constant 0 : index
    %110 = vector.load %arg12[%c0_56, %c0_57, %c0_58] : memref<4x4x16xf32, #tpu.memory_space<vmem>>, vector<1x4x16xf32>
    %111 = vector.shape_cast %110 : vector<1x4x16xf32> to vector<4x16xf32>
    %cst_59 = arith.constant dense<0.000000e+00> : vector<4x128xf32>
    %112 = tpu.matmul %111, %107, %cst_59 {dimension_numbers = #tpu.dot_dimension_numbers<[1], [0], [0], [1], [0, 0, 1, 1], [], []>} : vector<4x16xf32>, vector<16x128xf32>, vector<4x128xf32> -> vector<4x128xf32>
    %cst_60 = arith.constant dense<0.000000e+00> : vector<4x4xf32>
    %113 = tpu.matmul %112, %112, %cst_60 {dimension_numbers = #tpu.dot_dimension_numbers<[1], [1], [0], [0], [0, 0, 1, 0], [], []>} : vector<4x128xf32>, vector<4x128xf32>, vector<4x4xf32> -> vector<4x4xf32>
    %114 = arith.addf %109, %113 : vector<4x4xf32>
    %c1 = arith.constant 1 : index
    %c0_61 = arith.constant 0 : index
    %c0_62 = arith.constant 0 : index
    %115 = vector.load %arg12[%c1, %c0_61, %c0_62] : memref<4x4x16xf32, #tpu.memory_space<vmem>>, vector<1x4x16xf32>
    %116 = vector.shape_cast %115 : vector<1x4x16xf32> to vector<4x16xf32>
    %cst_63 = arith.constant dense<0.000000e+00> : vector<4x128xf32>
    %117 = tpu.matmul %116, %107, %cst_63 {dimension_numbers = #tpu.dot_dimension_numbers<[1], [0], [0], [1], [0, 0, 1, 1], [], []>} : vector<4x16xf32>, vector<16x128xf32>, vector<4x128xf32> -> vector<4x128xf32>
    %cst_64 = arith.constant dense<0.000000e+00> : vector<4x4xf32>
    %118 = tpu.matmul %117, %117, %cst_64 {dimension_numbers = #tpu.dot_dimension_numbers<[1], [1], [0], [0], [0, 0, 1, 0], [], []>} : vector<4x128xf32>, vector<4x128xf32>, vector<4x4xf32> -> vector<4x4xf32>
    %119 = arith.addf %114, %118 : vector<4x4xf32>
    %c2 = arith.constant 2 : index
    %c0_65 = arith.constant 0 : index
    %c0_66 = arith.constant 0 : index
    %120 = vector.load %arg12[%c2, %c0_65, %c0_66] : memref<4x4x16xf32, #tpu.memory_space<vmem>>, vector<1x4x16xf32>
    %121 = vector.shape_cast %120 : vector<1x4x16xf32> to vector<4x16xf32>
    %cst_67 = arith.constant dense<0.000000e+00> : vector<4x128xf32>
    %122 = tpu.matmul %121, %107, %cst_67 {dimension_numbers = #tpu.dot_dimension_numbers<[1], [0], [0], [1], [0, 0, 1, 1], [], []>} : vector<4x16xf32>, vector<16x128xf32>, vector<4x128xf32> -> vector<4x128xf32>
    %cst_68 = arith.constant dense<0.000000e+00> : vector<4x4xf32>
    %123 = tpu.matmul %122, %122, %cst_68 {dimension_numbers = #tpu.dot_dimension_numbers<[1], [1], [0], [0], [0, 0, 1, 0], [], []>} : vector<4x128xf32>, vector<4x128xf32>, vector<4x4xf32> -> vector<4x4xf32>
    %124 = arith.addf %119, %123 : vector<4x4xf32>
    %c3 = arith.constant 3 : index
    %c0_69 = arith.constant 0 : index
    %c0_70 = arith.constant 0 : index
    %125 = vector.load %arg12[%c3, %c0_69, %c0_70] : memref<4x4x16xf32, #tpu.memory_space<vmem>>, vector<1x4x16xf32>
    %126 = vector.shape_cast %125 : vector<1x4x16xf32> to vector<4x16xf32>
    %cst_71 = arith.constant dense<0.000000e+00> : vector<4x128xf32>
    %127 = tpu.matmul %126, %107, %cst_71 {dimension_numbers = #tpu.dot_dimension_numbers<[1], [0], [0], [1], [0, 0, 1, 1], [], []>} : vector<4x16xf32>, vector<16x128xf32>, vector<4x128xf32> -> vector<4x128xf32>
    %cst_72 = arith.constant dense<0.000000e+00> : vector<4x4xf32>
    %128 = tpu.matmul %127, %127, %cst_72 {dimension_numbers = #tpu.dot_dimension_numbers<[1], [1], [0], [0], [0, 0, 1, 0], [], []>} : vector<4x128xf32>, vector<4x128xf32>, vector<4x4xf32> -> vector<4x4xf32>
    %129 = arith.addf %124, %128 : vector<4x4xf32>
    %130 = tpu.iota {dimensions = array<i32: 0>} : vector<4x4xi32>
    %131 = tpu.iota {dimensions = array<i32: 1>} : vector<4x4xi32>
    %132 = arith.cmpi eq, %130, %131 : vector<4x4xi32>
    %133 = arith.extui %132 : vector<4x4xi1> to vector<4x4xi32>
    %134 = arith.sitofp %133 : vector<4x4xi32> to vector<4x4xf32>
    %135 = arith.mulf %129, %134 : vector<4x4xf32>
    %cst_73 = arith.constant dense<0.000000e+00> : vector<4xf32>
    %136 = vector.multi_reduction <add>, %135, %cst_73 [1] : vector<4x4xf32> to vector<4xf32>
    %137 = vector.shape_cast %136 : vector<4xf32> to vector<4x1xf32>
    %138 = arith.mulf %129, %134 : vector<4x4xf32>
    %cst_74 = arith.constant dense<0.000000e+00> : vector<4xf32>
    %139 = vector.multi_reduction <add>, %138, %cst_74 [0] : vector<4x4xf32> to vector<4xf32>
    %140 = vector.shape_cast %139 : vector<4xf32> to vector<1x4xf32>
    %141 = math.rsqrt %137 : vector<4x1xf32>
    %142 = vector.broadcast %141 : vector<4x1xf32> to vector<4x4xf32>
    %143 = arith.mulf %129, %142 : vector<4x4xf32>
    %144 = math.rsqrt %140 : vector<1x4xf32>
    %145 = vector.broadcast %144 : vector<1x4xf32> to vector<4x4xf32>
    %146 = arith.mulf %143, %145 : vector<4x4xf32>
    %c0_75 = arith.constant 0 : index
    %c0_76 = arith.constant 0 : index
    %147 = vector.load %arg16[%c0_75, %c0_76] : memref<4x4xf32, #tpu.memory_space<vmem>>, vector<4x4xf32>
    tpu.vector_store %arg16[%c0_75, %c0_76], %146 {strides = array<i32>} : memref<4x4xf32, #tpu.memory_space<vmem>>, vector<4x4xf32>,
    %c0_77 = arith.constant 0 : index
    %c0_78 = arith.constant 0 : index
    %148 = vector.load %arg13[%c0_77, %c0_78] : memref<4x4xbf16, #tpu.memory_space<vmem>>, vector<4x4xbf16>
    %149 = arith.extf %148 : vector<4x4xbf16> to vector<4x4xf32>
    %150 = arith.subf %146, %149 : vector<4x4xf32>
    %151 = arith.mulf %150, %150 : vector<4x4xf32>
    %cst_79 = arith.constant dense<0.000000e+00> : vector<4xf32>
    %152 = vector.multi_reduction <add>, %151, %cst_79 [1] : vector<4x4xf32> to vector<4xf32>
    %153 = vector.shape_cast %152 : vector<4xf32> to vector<4x1xf32>
    %cst_80 = arith.constant dense<0.000000e+00> : vector<1xf32>
    %154 = vector.multi_reduction <add>, %153, %cst_80 [0] : vector<4x1xf32> to vector<1xf32>
    %155 = vector.shape_cast %154 : vector<1xf32> to vector<1x1xf32>
    %cst_81 = arith.constant 6.250000e-02 : f32
    %156 = vector.broadcast %cst_81 : f32 to vector<1x1xf32>
    %157 = arith.mulf %155, %156 : vector<1x1xf32>
    %c0_82 = arith.constant 0 : index
    %c0_83 = arith.constant 0 : index
    %158 = vector.load %arg17[%c0_82, %c0_83] : memref<1x1xf32, #tpu.memory_space<vmem>>, vector<1x1xf32>
    tpu.vector_store %arg17[%c0_82, %c0_83], %157 {strides = array<i32>} : memref<1x1xf32, #tpu.memory_space<vmem>>, vector<1x1xf32>,
    return
  }
}

</mosaic_0001>

<bundles_post_ra>
// kernel: reverse.0
= control target key start
LH: loop header
LB: loop body
LE: loop exit
PB: predicated region body
PF: predicated region fallthrough
CT: control target
= control target key end

     0   :  { %v2_v0 = vlaneseq  ;;  %s112_s0 = inlined_call_operand.vmem [shape: f32[4,1,15], index: 0, kind: input, shape index: {}]   ;;  %s113_s1 = inlined_call_operand.vmem [shape: f32[4,1,15], index: 1, kind: output, shape index: {}]  }
   0x2   :  { %v3_v1 = vsub.s32 14, %v2_v0 }
   0x4   :  { %4 = vset.pattern.permute.xlu0 %v3_v1 }
   0x5   :  { %v21_v2 = vld [vmem:[%s112_s0] sm:$0xf] }
   0x6   :  { %22 = vst [vmem:[#allocation1] sm:$0xf] %v21_v2 }
   0xd   :  { %v41_v3 = vld [vmem:[#allocation1] sm:$0xf] }
   0xe   :  { %42 = vst [vmem:[#allocation0] sm:$0xf] %v41_v3 }
  0x15   :  { %v43_v4 = vld [vmem:[#allocation0] sm:$0xff] }
  0x16   :  { %44 = vperm.xlu0 %4, %v43_v4  }
  0x91   :  { %v45_v5 = vpop.permute.xlu0 %44 }
  0x92   :  { %46 = vst [vmem:[#allocation2] sm:$0xff] %v45_v5 }
  0x99   :  { %v51_v6 = vld [vmem:[#allocation2] sm:$0xf] }
  0x9a   :  { %54 = vst [vmem:[#allocation3] sm:$0xf] %v51_v6 }
  0xa1   :  { %v71_v7 = vld [vmem:[#allocation3] sm:$0xf] }
  0xa2   :  { %72 = vst [vmem:[%s113_s1] sm:$0xf] %v71_v7 }

// kernel: forward.1
= control target key start
LH: loop header
LB: loop body
LE: loop exit
PB: predicated region body
PF: predicated region fallthrough
CT: control target
= control target key end

     0   :  { %s4056_s0 = inlined_call_operand.vmem [shape: bf16[256,128], index: 0, kind: input, shape index: {}]   ;;  %s4057_s1 = inlined_call_operand.vmem [shape: bf16[64,256], index: 1, kind: input, shape index: {}]   ;;  %s4058_s2 = inlined_call_operand.vmem [shape: f32[64,1], index: 2, kind: input, shape index: {}]   ;;  %s4059_s3 = inlined_call_operand.vmem [shape: f32[16,16], index: 3, kind: input, shape index: {}]   ;;  %s4060_s4 = inlined_call_operand.vmem [shape: f32[16,32], index: 4, kind: input, shape index: {}]   ;;  %s4061_s5 = inlined_call_operand.vmem [shape: f32[1,32], index: 5, kind: input, shape index: {}]   ;;  %s4062_s6 = inlined_call_operand.vmem [shape: f32[32,64], index: 6, kind: input, shape index: {}]   ;;  %s4063_s7 = inlined_call_operand.vmem [shape: f32[1,64], index: 7, kind: input, shape index: {}]   ;;  %s4064_s8 = inlined_call_operand.vmem [shape: f32[128,128], index: 8, kind: input, shape index: {}]   ;;  %s4065_s9 = inlined_call_operand.vmem [shape: f32[1,128], index: 9, kind: input, shape index: {}]   ;;  %s4066_s10 = inlined_call_operand.vmem [shape: f32[64,128], index: 10, kind: input, shape index: {}]   ;;  %s4067_s11 = inlined_call_operand.vmem [shape: f32[1,128], index: 11, kind: input, shape index: {}]   ;;  %s4068_s12 = inlined_call_operand.vmem [shape: f32[4,4,16], index: 12, kind: input, shape index: {}]   ;;  %s4069_s13 = inlined_call_operand.vmem [shape: bf16[4,4], index: 13, kind: input, shape index: {}]   ;;  %s4070_s14 = inlined_call_operand.hbm [shape: f32[64,128], index: 14, kind: output, shape index: {0}]   ;;  %s4071_s15 = inlined_call_operand.hbm [shape: f32[16,128], index: 15, kind: output, shape index: {1}]   ;;  %s4072_s16 = inlined_call_operand.hbm [shape: f32[4,4], index: 16, kind: output, shape index: {2}]   ;;  %s4073_s17 = inlined_call_operand.hbm [shape: f32[1,1], index: 17, kind: output, shape index: {3}]  }
   0x1   :  { %4076 = sst [smem:[#allocation12_spill]] %s4056_s0 }
   0x2   :  { %4077 = sst [smem:[#allocation13_spill]] %s4057_s1 }
   0x3   :  { %23 = vsyncpa [#allocation3], 0 }
   0x4   :  { %24 = vsyncpa [#allocation5], 0  ;;  %s4078_s26 = sld [smem:[#allocation12_spill]]  ;;  %v355_v2 = vld [vmem:[%s4060_s4 + $0x8] sm:$0xff]  ;;  %v3405_v3 = vmov 0   ;;  %v354_v5 = vld [vmem:[%s4060_s4] sm:$0xff] }
   0x5   :  { %3253 = vset.pattern.permute.xlu0 %v3405_v3  ;;  %2947 = vmatprep.subr.mxu1 %v355_v2  ;;  %vm363_vm0 = vcmask 130048   ;;  %v352_v7 = vld [vmem:[%s4059_s3] sm:$0xff]  ;;  %v353_v8 = vld [vmem:[%s4059_s3 + $0x8] sm:$0xff]  ;;  %s4079_s4 = sld [smem:[#allocation13_spill]]  ;;  %v97_v21 = vld [vmem:[%s4058_s2 + $0x10] sm:$0xff] }
   0x6   :  { %2948 = vmatpush3.msra.mxu1 %v355_v2  ;;  %3254 = vset.pattern.permute.xlu1 %v3405_v3  ;;  %v95_v19 = vld [vmem:[%s4058_s2] sm:$0xff]  ;;  %v96_v23 = vld [vmem:[%s4058_s2 + $0x8] sm:$0xff]  ;;  %v98_v24 = vld [vmem:[%s4058_s2 + $0x18] sm:$0xff] }
   0x7   :  { %2949 = vmatprep.subr.mxu1 %v354_v5  ;;  %2951 = vmatprep.mubr.msk.f32.mxu1 %vm363_vm0, %v352_v7  ;;  %v448_v25 = vld [vmem:[%s4062_s6 + $0x18] sm:$0xff] }
   0x8   :  { %2950 = vmatpush3.msra.mxu1 %v354_v5  ;;  %105 = vperm.xlu0 %3253, %v95_v19  }
   0x9   :  { %2952 = vmatmul.mubr.msk.f32.vlgmr.msra.gmra.mxu1 %vm363_vm0, %v353_v8  ;;  %115 = vperm.xlu1 %3254, %v97_v21  }
   0xa   :  { %v3255_v0 = vld [vmem:[%s4078_s26 + $0x78] sm:$0xff]   ;;  %v3257_v4 = vld [vmem:[%s4078_s26 + $0x70] sm:$0xff]   ;;  %v3259_v9 = vld [vmem:[%s4078_s26 + $0x68] sm:$0xff]   ;;  %2954 = vmatprep.subr.mxu1 %v448_v25 }
   0xb   :  { %v3256_v1 = vld [vmem:[%s4078_s26 + $0x38] sm:$0xff]   ;;  %2757 = vmatprep.subr.bf16.mxu0 %v3255_v0  ;;  %v3258_v6 = vld [vmem:[%s4078_s26 + $0x30] sm:$0xff]   ;;  %v3260_v10 = vld [vmem:[%s4078_s26 + $0x28] sm:$0xff]  }
   0xc   :  { %2758 = vmatpush3.bf16.msra.mxu0 %v3256_v1  ;;  %v3261_v11 = vld [vmem:[%s4078_s26 + $0x60] sm:$0xff]   ;;  %v3263_v13 = vld [vmem:[%s4078_s26 + $0x58] sm:$0xff]   ;;  %v3265_v15 = vld [vmem:[%s4078_s26 + $0x50] sm:$0xff]  }
   0xd   :  { %2759 = vmatprep.subr.bf16.mxu0 %v3257_v4  ;;  %v3262_v12 = vld [vmem:[%s4078_s26 + $0x20] sm:$0xff]   ;;  %v3264_v14 = vld [vmem:[%s4078_s26 + $0x18] sm:$0xff]   ;;  %v3266_v17 = vld [vmem:[%s4078_s26 + $0x10] sm:$0xff]  }
   0xe   :  { %v3273_v16 = vld [vmem:[%s4079_s4 + $0x4] ss:$8 sps:$4 sm:$0xff]  }
   0xf   :  { %v3267_v18 = vld [vmem:[%s4078_s26 + $0x48] sm:$0xff]   ;;  %311 = vmatprep.mubr.bf16.mxu0 %v3273_v16  ;;  %v3269_v22 = vld [vmem:[%s4078_s26 + $0x40] sm:$0xff]  }
  0x10   :  { %2760 = vmatpush3.bf16.msra.mxu0 %v3258_v6  ;;  %v3268_v20 = vld [vmem:[%s4078_s26 + $0x8] sm:$0xff]  }
  0x11   :  { %2761 = vmatprep.subr.bf16.mxu0 %v3259_v9 }
  0x14   :  { %2762 = vmatpush3.bf16.msra.mxu0 %v3260_v10 }
  0x15   :  { %2763 = vmatprep.subr.bf16.mxu0 %v3261_v11 }
  0x18   :  { %2764 = vmatpush3.bf16.msra.mxu0 %v3262_v12 }
  0x19   :  { %2765 = vmatprep.subr.bf16.mxu0 %v3263_v13 }
  0x1c   :  { %2766 = vmatpush3.bf16.msra.mxu0 %v3264_v14 }
  0x1d   :  { %2767 = vmatprep.subr.bf16.mxu0 %v3265_v15 }
  0x20   :  { %2768 = vmatpush3.bf16.msra.mxu0 %v3266_v17 }
  0x21   :  { %2769 = vmatprep.subr.bf16.mxu0 %v3267_v18 }
  0x22   :  { %25 = vsyncpa [#allocation8], 0  ;;  %v3270_v26 = vld [vmem:[%s4078_s26] sm:$0xff]   ;;  %110 = vperm.xlu0 %3253, %v96_v23   ;;  %v447_v27 = vld [vmem:[%s4062_s6 + $0x10] sm:$0xff]  ;;  %120 = vperm.xlu1 %3254, %v98_v24   ;;  %vm456_vm1 = vcmask 261120   ;;  %vm781_vm2 = vcmask 523264  }
  0x23   :  { %v99_v28 = vld [vmem:[%s4058_s2 + $0x20] sm:$0xff]  ;;  %v100_v29 = vld [vmem:[%s4058_s2 + $0x28] sm:$0xff]  ;;  %2955 = vmatpush3.msra.mxu1 %v448_v25  ;;  %v3274_v31 = vld [vmem:[%s4079_s4 + $0x14] ss:$8 sps:$4 sm:$0xff]   ;;  %s3408_s26 = smov 48   ;;  %s3409_s24 = smov 96  }
  0x24   :  { %2770 = vmatpush3.bf16.msra.mxu0 %v3268_v20  ;;  %v3271_v30 = vld [vmem:[%s4079_s4] ss:$8 sps:$4 sm:$0xff]   ;;  %2956 = vmatprep.subr.mxu1 %v447_v27  ;;  %v101_v32 = vld [vmem:[%s4058_s2 + $0x30] sm:$0xff]  ;;  %v102_v33 = vld [vmem:[%s4058_s2 + $0x38] sm:$0xff]  ;;  %s3410_s3 = smov 32   ;;  %s3411_s18 = smov 80  }
  0x25   :  { %2771 = vmatprep.subr.bf16.mxu0 %v3269_v22  ;;  %2957 = vmatpush3.msra.mxu1 %v447_v27  ;;  %v3276_v34 = vld [vmem:[%s4079_s4 + $0x10] ss:$8 sps:$4 sm:$0xff]   ;;  %v3277_v35 = vld [vmem:[%s4079_s4 + $0x24] ss:$8 sps:$4 sm:$0xff]   ;;  %v3279_v36 = vld [vmem:[%s4079_s4 + $0x20] ss:$8 sps:$4 sm:$0xff]  }
  0x26   :  { %125 = vperm.xlu0 %3253, %v99_v28   ;;  %130 = vperm.xlu1 %3254, %v100_v29   ;;  %v3280_v37 = vld [vmem:[%s4079_s4 + $0x34] ss:$8 sps:$4 sm:$0xff]   ;;  %v3282_v38 = vld [vmem:[%s4079_s4 + $0x30] ss:$8 sps:$4 sm:$0xff]   ;;  %v446_v39 = vld [vmem:[%s4062_s6 + $0x8] sm:$0xff]  ;;  %s3412_s2 = smov 16  }
  0x27   :  { %2958 = vmatprep.subr.mxu1 %v446_v39  ;;  %v445_v40 = vld [vmem:[%s4062_s6] sm:$0xff]  ;;  %v553_v41 = vld [vmem:[%s4064_s8 + $0x78] sm:$0xff]  ;;  %v552_v47 = vld [vmem:[%s4064_s8 + $0x70] sm:$0xff]  ;;  %vm3414_vm3 = vmmov 0   ;;  %vm2569_vm5 = vcmask 27648   ;;  %s3415_s0 = smov [#allocation4]  }
  0x28   :  { %2772 = vmatpush3.bf16.msra.mxu0 %v3270_v26  ;;  %2959 = vmatpush3.msra.mxu1 %v446_v39  ;;  %v2685_v42 = vld [vmem:[%s4061_s5] ss:$0 sm:$0xff]  ;;  %v551_v48 = vld [vmem:[%s4064_s8 + $0x68] sm:$0xff]  ;;  %v549_v50 = vld [vmem:[%s4064_s8 + $0x58] sm:$0xff]  ;;  %s2619_s30 = sshll.u32 %s3415_s0, 4  ;;  %s3416_s6 = smov [#allocation2]   ;;  %s2620_s30 = int_to_ptr.vmem [resolvable:$true] %s2619_s30 }
  0x29   :  { %2960 = vmatprep.subr.mxu1 %v445_v40  ;;  %v550_v49 = vld [vmem:[%s4064_s8 + $0x60] sm:$0xff]  ;;  %v548_v51 = vld [vmem:[%s4064_s8 + $0x50] sm:$0xff]  ;;  %v547_v52 = vld [vmem:[%s4064_s8 + $0x48] sm:$0xff]  ;;  %p3324_p1 = scmp.lt.s32.totalorder %s2620_s30, %s2620_s30 }
  0x2a   :  { %135 = vperm.xlu0 %3253, %v101_v32   ;;  %140 = vperm.xlu1 %3254, %v102_v33   ;;  %v546_v53 = vld [vmem:[%s4064_s8 + $0x40] sm:$0xff]  ;;  %v545_v54 = vld [vmem:[%s4064_s8 + $0x38] sm:$0xff]  ;;  %v544_v55 = vld [vmem:[%s4064_s8 + $0x30] sm:$0xff] }
  0x2b   :  { %312 = vmatmul.mubr.bf16.vlgmr.msra.gmra.mxu0 %v3271_v30  ;;  %2961 = vmatpush3.msra.mxu1 %v445_v40  ;;  %v543_v56 = vld [vmem:[%s4064_s8 + $0x28] sm:$0xff]  ;;  %v542_v57 = vld [vmem:[%s4064_s8 + $0x20] sm:$0xff]  ;;  %v541_v59 = vld [vmem:[%s4064_s8 + $0x18] sm:$0xff] }
  0x2c   :  { %319 = vmatprep.mubr.bf16.mxu0 %v3274_v31  ;;  %2965 = vmatprep.subr.mxu1 %v553_v41  ;;  %v540_v62 = vld [vmem:[%s4064_s8 + $0x10] sm:$0xff]  ;;  %v539_v1 = vld [vmem:[%s4064_s8 + $0x8] sm:$0xff]  ;;  %v538_v5 = vld [vmem:[%s4064_s8] sm:$0xff] }
  0x33   :  { %320 = vmatmul.mubr.bf16.gmra.mxu0 %v3276_v34 }
  0x34   :  { %327 = vmatprep.mubr.bf16.mxu0 %v3277_v35 }
  0x3b   :  { %328 = vmatmul.mubr.bf16.gmra.mxu0 %v3279_v36 }
  0x3c   :  { %335 = vmatprep.mubr.bf16.mxu0 %v3280_v37 }
  0x43   :  { %336 = vmatmul.mubr.bf16.gmra.mxu0 %v3282_v38  ;;  %v2688_v38 = vld [vmem:[%s4063_s7] ss:$0 sm:$0xff]  ;;  %s3406_s7 = smov 64  }
  0x83   :  { %v106_v60 = vpop.permute.xlu0 %105 }
  0x84   :  { %v116_v9 = vpop.permute.xlu1 %115 }
  0x9d   :  { %v111_v4 = vpop.permute.xlu0 %110  ;;  %v121_v16 = vpop.permute.xlu1 %120 }
  0xa1   :  { %v126_v21 = vpop.permute.xlu0 %125  ;;  %v131_v26 = vpop.permute.xlu1 %130 }
  0xa5   :  { %v136_v31 = vpop.permute.xlu0 %135  ;;  %v141_v36 = vpop.permute.xlu1 %140 }
  0xc9   :  { %v2953_v43 = vpop.f32.mrf.mxu1 }
  0xca   :  { %v442_v44 = vadd.f32 %v2953_v43, %v2685_v42 }
  0xcb   :  { %v436_v45 = vpop.f32.mrf.mxu1 }
  0xcc   :  { %v437_v46 = vadd.f32 %v2685_v42, %v436_v45 }
  0xce   :  { %2962 = vmatprep.mubr.msk.f32.mxu1 %vm456_vm1, %v437_v46 }
  0xcf   :  { %2963 = vmatmul.mubr.msk.f32.vlgmr.msra.gmra.mxu1 %vm456_vm1, %v442_v44 }
  0xd0   :  { %2966 = vmatpush3.msra.mxu1 %v553_v41 }
  0xd1   :  { %2967 = vmatprep.subr.mxu1 %v552_v47 }
  0xd2   :  { %2968 = vmatpush3.msra.mxu1 %v552_v47 }
  0xd3   :  { %2969 = vmatprep.subr.mxu1 %v551_v48 }
  0xd4   :  { %2970 = vmatpush3.msra.mxu1 %v551_v48 }
  0xd5   :  { %2971 = vmatprep.subr.mxu1 %v550_v49 }
  0xd6   :  { %2972 = vmatpush3.msra.mxu1 %v550_v49  ;;  %v2691_v49 = vld [vmem:[%s4065_s9] ss:$0 sm:$0xff]  ;;  %s3407_s9 = smov 112  }
  0xd7   :  { %2973 = vmatprep.subr.mxu1 %v549_v50 }
  0xd8   :  { %2974 = vmatpush3.msra.mxu1 %v549_v50 }
  0xd9   :  { %2975 = vmatprep.subr.mxu1 %v548_v51 }
  0xda   :  { %2976 = vmatpush3.msra.mxu1 %v548_v51 }
  0xdb   :  { %2977 = vmatprep.subr.mxu1 %v547_v52 }
  0xdc   :  { %2978 = vmatpush3.msra.mxu1 %v547_v52 }
  0xdd   :  { %2979 = vmatprep.subr.mxu1 %v546_v53 }
  0xde   :  { %2980 = vmatpush3.msra.mxu1 %v546_v53 }
  0xdf   :  { %2981 = vmatprep.subr.mxu1 %v545_v54 }
  0xe0   :  { %2982 = vmatpush3.msra.mxu1 %v545_v54 }
  0xe1   :  { %2983 = vmatprep.subr.mxu1 %v544_v55 }
  0xe2   :  { %2984 = vmatpush3.msra.mxu1 %v544_v55 }
  0xe3   :  { %2985 = vmatprep.subr.mxu1 %v543_v56 }
  0xe4   :  { %2986 = vmatpush3.msra.mxu1 %v543_v56 }
  0xe5   :  { %2987 = vmatprep.subr.mxu1 %v542_v57 }
  0xe6   :  { %2988 = vmatpush3.msra.mxu1 %v542_v57 }
  0xe7   :  { %2989 = vmatprep.subr.mxu1 %v541_v59 }
  0xe8   :  { %2990 = vmatpush3.msra.mxu1 %v541_v59 }
  0xe9   :  { %2991 = vmatprep.subr.mxu1 %v540_v62 }
  0xea   :  { %2992 = vmatpush3.msra.mxu1 %v540_v62 }
  0xeb   :  { %v2773_v58 = vpop.f32.mrf.mxu0  ;;  %2993 = vmatprep.subr.mxu1 %v539_v1 }
  0xec   :  { %2994 = vmatpush3.msra.mxu1 %v539_v1 }
  0xed   :  { %v2774_v61 = vpop.f32.mrf.mxu0  ;;  %2995 = vmatprep.subr.mxu1 %v538_v5 }
  0xee   :  { %v2775_v63 = vadd.f32 %v2774_v61, %v2773_v58  ;;  %2996 = vmatpush3.msra.mxu1 %v538_v5 }
  0xef   :  { %v2776_v0 = vpop.f32.mrf.mxu0 }
  0xf0   :  { %v314_v2 = vadd.f32 %v2775_v63, %v106_v60 }
  0xf1   :  { %v2777_v3 = vpop.f32.mrf.mxu0 }
  0xf2   :  { %344 = vst [vmem:[#allocation2] sm:$0xff] %v314_v2  ;;  %v2778_v6 = vadd.f32 %v2777_v3, %v2776_v0  ;;  %2997 = vmatprep.mubr.f32.mxu1 %v314_v2 }
  0xf3   :  { %v2779_v7 = vpop.f32.mrf.mxu0 }
  0xf4   :  { %v317_v8 = vadd.f32 %v2778_v6, %v111_v4 }
  0xf5   :  { %v2780_v10 = vpop.f32.mrf.mxu0 }
  0xf6   :  { %345 = vst [vmem:[#allocation2 + $0x8] sm:$0xff] %v317_v8  ;;  %v2781_v11 = vadd.f32 %v2780_v10, %v2779_v7  ;;  %2998 = vmatmul.mubr.f32.vlgmr.msra.gmra.mxu1 %v317_v8 }
  0xf7   :  { %v2782_v12 = vpop.f32.mrf.mxu0 }
  0xf8   :  { %v322_v13 = vadd.f32 %v2781_v11, %v116_v9 }
  0xf9   :  { %v2783_v14 = vpop.f32.mrf.mxu0 }
  0xfa   :  { %346 = vst [vmem:[#allocation2 + $0x10] sm:$0xff] %v322_v13  ;;  %v2784_v15 = vadd.f32 %v2783_v14, %v2782_v12  ;;  %3000 = vmatprep.mubr.f32.mxu1 %v322_v13 }
  0xfb   :  { %v2785_v17 = vpop.f32.mrf.mxu0 }
  0xfc   :  { %v325_v18 = vadd.f32 %v2784_v15, %v121_v16 }
  0xfd   :  { %v2786_v19 = vpop.f32.mrf.mxu0 }
  0xfe   :  { %347 = vst [vmem:[#allocation2 + $0x18] sm:$0xff] %v325_v18  ;;  %v2787_v20 = vadd.f32 %v2786_v19, %v2785_v17  ;;  %3001 = vmatmul.mubr.f32.gmra.mxu1 %v325_v18 }
  0xff   :  { %v2788_v22 = vpop.f32.mrf.mxu0 }
 0x100   :  { %v330_v23 = vadd.f32 %v2787_v20, %v126_v21 }
 0x101   :  { %v2789_v24 = vpop.f32.mrf.mxu0 }
 0x102   :  { %348 = vst [vmem:[#allocation2 + $0x20] sm:$0xff] %v330_v23  ;;  %v2790_v25 = vadd.f32 %v2789_v24, %v2788_v22  ;;  %3003 = vmatprep.mubr.f32.mxu1 %v330_v23 }
 0x103   :  { %v2791_v27 = vpop.f32.mrf.mxu0 }
 0x104   :  { %v333_v28 = vadd.f32 %v2790_v25, %v131_v26 }
 0x105   :  { %v2792_v29 = vpop.f32.mrf.mxu0 }
 0x106   :  { %349 = vst [vmem:[#allocation2 + $0x28] sm:$0xff] %v333_v28  ;;  %v2793_v30 = vadd.f32 %v2792_v29, %v2791_v27  ;;  %3004 = vmatmul.mubr.f32.gmra.mxu1 %v333_v28 }
 0x107   :  { %v2794_v32 = vpop.f32.mrf.mxu0 }
 0x108   :  { %v338_v33 = vadd.f32 %v2793_v30, %v136_v31 }
 0x109   :  { %v2795_v34 = vpop.f32.mrf.mxu0 }
 0x10a   :  { %350 = vst [vmem:[#allocation2 + $0x30] sm:$0xff] %v338_v33  ;;  %v2796_v35 = vadd.f32 %v2795_v34, %v2794_v32  ;;  %3006 = vmatprep.mubr.f32.mxu1 %v338_v33 }
 0x10c   :  { %v341_v37 = vadd.f32 %v2796_v35, %v141_v36 }
 0x10e   :  { %351 = vst [vmem:[#allocation2 + $0x38] sm:$0xff] %v341_v37  ;;  %3007 = vmatmul.mubr.f32.gmra.mxu1 %v341_v37 }
 0x18f   :  { %v2964_v39 = vpop.f32.mrf.mxu1 }
 0x190   :  { %v3687_v40 = vadd.f32 %v2964_v39, %v2688_v38 }
 0x191   :  { %v529_v41 = vpop.f32.mrf.mxu1 }
 0x192   :  { %v3689_v42 = vadd.f32 %v2688_v38, %v529_v41 }
 0x194   :  { %3025 = vmatprep.mubr.msk.f32.mxu0 %vm363_vm0, %v3689_v42 }
 0x1b6   :  { %v2999_v43 = vpop.f32.mrf.mxu1 }
 0x1b7   :  { %v3730_v58 = vadd.f32 %v2999_v43, %v2691_v49 }
 0x1b8   :  { %v627_v44 = vpop.f32.mrf.mxu1 }
 0x1b9   :  { %v3736_v59 = vadd.f32 %v2691_v49, %v627_v44 }
 0x1be   :  { %v3002_v45 = vpop.f32.mrf.mxu1 }
 0x1bf   :  { %v3718_v56 = vadd.f32 %v3002_v45, %v2691_v49 }
 0x1c0   :  { %v637_v46 = vpop.f32.mrf.mxu1 }
 0x1c1   :  { %v3724_v57 = vadd.f32 %v2691_v49, %v637_v46 }
 0x1c6   :  { %v3005_v47 = vpop.f32.mrf.mxu1 }
 0x1c7   :  { %v3706_v54 = vadd.f32 %v3005_v47, %v2691_v49 }
 0x1c8   :  { %v647_v48 = vpop.f32.mrf.mxu1 }
 0x1c9   :  { %v3712_v55 = vadd.f32 %v2691_v49, %v647_v48 }
 0x1ce   :  { %v3008_v50 = vpop.f32.mrf.mxu1 }
 0x1cf   :  { %v3696_v51 = vadd.f32 %v3008_v50, %v2691_v49 }
 0x1d0   :  { %v657_v52 = vpop.f32.mrf.mxu1 }
 0x1d1   :  { %v3698_v53 = vadd.f32 %v2691_v49, %v657_v52  ;;  %3009 = vmatprep.subr.msk.mxu0 %vm363_vm0, %v3696_v51 }
 0x1d2   :  { %3010 = vmatpush3.xpose.msk.msra.mxu0 %vm363_vm0, %v3696_v51 }
 0x1d3   :  { %3011 = vmatprep.subr.msk.mxu0 %vm363_vm0, %v3698_v53 }
 0x1d6   :  { %3012 = vmatpush3.xpose.msk.msra.mxu0 %vm363_vm0, %v3698_v53 }
 0x1d7   :  { %3013 = vmatprep.subr.msk.mxu0 %vm363_vm0, %v3706_v54 }
 0x1da   :  { %3014 = vmatpush3.xpose.msk.msra.mxu0 %vm363_vm0, %v3706_v54 }
 0x1db   :  { %3015 = vmatprep.subr.msk.mxu0 %vm363_vm0, %v3712_v55 }
 0x1de   :  { %3016 = vmatpush3.xpose.msk.msra.mxu0 %vm363_vm0, %v3712_v55 }
 0x1df   :  { %3017 = vmatprep.subr.msk.mxu0 %vm363_vm0, %v3718_v56 }
 0x1e2   :  { %3018 = vmatpush3.xpose.msk.msra.mxu0 %vm363_vm0, %v3718_v56 }
 0x1e3   :  { %3019 = vmatprep.subr.msk.mxu0 %vm363_vm0, %v3724_v57 }
 0x1e6   :  { %3020 = vmatpush3.xpose.msk.msra.mxu0 %vm363_vm0, %v3724_v57 }
 0x1e7   :  { %3021 = vmatprep.subr.msk.mxu0 %vm363_vm0, %v3730_v58 }
 0x1ea   :  { %3022 = vmatpush3.xpose.msk.msra.mxu0 %vm363_vm0, %v3730_v58 }
 0x1eb   :  { %3023 = vmatprep.subr.msk.mxu0 %vm363_vm0, %v3736_v59 }
 0x1ee   :  { %3024 = vmatpush3.xpose.msk.msra.mxu0 %vm363_vm0, %v3736_v59 }
 0x1f1   :  { %3026 = vmatmul.mubr.msk.f32.vlgmr.msra.gmra.mxu0 %vm363_vm0, %v3687_v40 }
 0x2b1   :  { %v3027_v60 = vpop.f32.mrf.mxu0 }
 0x2b2   :  { %v780_v61 = vmul.f32 0.25, %v3027_v60 }
 0x2b3   :  { %v770_v62 = vpop.f32.mrf.mxu0 }
 0x2b4   :  { %v779_v63 = vmul.f32 0.25, %v770_v62  ;;  %v785_v0 = vsel %vm781_vm2, %v780_v61, -inf }
 0x2b5   :  { %786 = vmax.xlane.f32.xlu1 %v785_v0 }
 0x2b6   :  { %v782_v1 = vsel %vm781_vm2, %v779_v63, -inf }
 0x2b7   :  { %783 = vmax.xlane.f32.xlu0 %v782_v1 }
 0x2c6   :  { %818 = vrot.lane.b32.xlu1 %v3696_v51, %s3406_s7 }
 0x2ca   :  { %814 = vrot.lane.b32.xlu1 %v3706_v54, %s3406_s7 }
 0x2cd   :  { %816 = vrot.lane.b32.xlu0 %v3698_v53, %s3406_s7 }
 0x2ce   :  { %812 = vrot.lane.b32.xlu1 %v3712_v55, %s3406_s7 }
 0x2d1   :  { %810 = vrot.lane.b32.xlu0 %v3718_v56, %s3406_s7 }
 0x2d2   :  { %808 = vrot.lane.b32.xlu1 %v3724_v57, %s3406_s7 }
 0x2d5   :  { %806 = vrot.lane.b32.xlu0 %v3730_v58, %s3406_s7 }
 0x2d6   :  { %804 = vrot.lane.b32.xlu1 %v3736_v59, %s3406_s7 }
 0x2da   :  { %925 = vrot.lane.b32.xlu1 %v3698_v53, %s3407_s9 }
 0x2de   :  { %921 = vrot.lane.b32.xlu1 %v3712_v55, %s3407_s9 }
 0x2e2   :  { %917 = vrot.lane.b32.xlu1 %v3724_v57, %s3407_s9 }
 0x2e6   :  { %913 = vrot.lane.b32.xlu1 %v3736_v59, %s3407_s9 }
 0x2ea   :  { %911 = vrot.lane.b32.xlu1 %v3687_v40, %s3407_s9 }
 0x33e   :  { %v787_v2 = vpop.xlane.xlu1 %786 }
 0x33f   :  { %v789_v3 = vsub.f32 %v780_v61, %v787_v2 }
 0x340   :  { %v784_v4 = vpop.xlane.xlu0 %783 }
 0x341   :  { %v792_v5 = vmul.f32 1.442695, %v789_v3  ;;  %v788_v6 = vsub.f32 %v779_v63, %v784_v4 }
 0x342   :  { %v819_v7 = vpop.permute.xlu1 %818 }
 0x343   :  { %3283 = vpow2.f32 %v792_v5  ;;  %v790_v8 = vmul.f32 1.442695, %v788_v6  ;;  %3028 = vmatprep.subr.mxu1 %v819_v7 }
 0x344   :  { %3029 = vmatpush3.msra.mxu1 %v819_v7  ;;  %v817_v9 = vpop.permute.xlu0 %816 }
 0x345   :  { %3285 = vpow2.f32 %v790_v8  ;;  %3030 = vmatprep.subr.mxu1 %v817_v9 }
 0x346   :  { %v815_v10 = vpop.permute.xlu1 %814  ;;  %3031 = vmatpush3.msra.mxu1 %v817_v9 }
 0x347   :  { %3032 = vmatprep.subr.mxu1 %v815_v10 }
 0x348   :  { %3033 = vmatpush3.msra.mxu1 %v815_v10  ;;  %v811_v11 = vpop.permute.xlu0 %810  ;;  %v669_v10 = vld [vmem:[%s4066_s10 + $0x18] sm:$0xff] }
 0x34a   :  { %v813_v12 = vpop.permute.xlu1 %812 }
 0x34b   :  { %3034 = vmatprep.subr.mxu1 %v813_v12 }
 0x34c   :  { %3035 = vmatpush3.msra.mxu1 %v813_v12  ;;  %v807_v15 = vpop.permute.xlu0 %806 }
 0x34d   :  { %3036 = vmatprep.subr.mxu1 %v811_v11 }
 0x34e   :  { %v809_v13 = vpop.permute.xlu1 %808  ;;  %3037 = vmatpush3.msra.mxu1 %v811_v11 }
 0x34f   :  { %3038 = vmatprep.subr.mxu1 %v809_v13 }
 0x350   :  { %v3284_v14 = vpop.eup %3283  ;;  %3039 = vmatpush3.msra.mxu1 %v809_v13 }
 0x351   :  { %3040 = vmatprep.subr.mxu1 %v807_v15  ;;  %v797_v16 = vsel %vm781_vm2, %v3284_v14, 0.0 }
 0x352   :  { %v3286_v17 = vpop.eup %3285  ;;  %v805_v18 = vpop.permute.xlu1 %804  ;;  %798 = vadd.xlane.f32.xlu0 %v797_v16  ;;  %3041 = vmatpush3.msra.mxu1 %v807_v15  ;;  %v668_v15 = vld [vmem:[%s4066_s10 + $0x10] sm:$0xff]  ;;  %v667_v16 = vld [vmem:[%s4066_s10 + $0x8] sm:$0xff] }
 0x353   :  { %3042 = vmatprep.subr.mxu1 %v805_v18  ;;  %v794_v19 = vsel %vm781_vm2, %v3286_v17, 0.0 }
 0x354   :  { %3043 = vmatpush3.msra.mxu1 %v805_v18 }
 0x356   :  { %795 = vadd.xlane.f32.xlu0 %v794_v19  ;;  %v926_v30 = vpop.permute.xlu1 %925 }
 0x35a   :  { %v922_v32 = vpop.permute.xlu1 %921 }
 0x35e   :  { %v918_v33 = vpop.permute.xlu1 %917 }
 0x362   :  { %v914_v34 = vpop.permute.xlu1 %913 }
 0x366   :  { %v912_v35 = vpop.permute.xlu1 %911 }
 0x36c   :  { %927 = vrot.lane.b32.xlu0 %v3696_v51, %s3407_s9 }
 0x370   :  { %923 = vrot.lane.b32.xlu0 %v3706_v54, %s3407_s9 }
 0x374   :  { %919 = vrot.lane.b32.xlu0 %v3718_v56, %s3407_s9 }
 0x378   :  { %915 = vrot.lane.b32.xlu0 %v3730_v58, %s3407_s9 }
 0x37c   :  { %909 = vrot.lane.b32.xlu0 %v3689_v42, %s3407_s9 }
 0x3db   :  { %v799_v20 = vpop.xlane.xlu0 %798 }
 0x3dc   :  { %3287 = vrcp.f32 %v799_v20 }
 0x3df   :  { %v796_v21 = vpop.xlane.xlu0 %795 }
 0x3e0   :  { %3289 = vrcp.f32 %v796_v21 }
 0x3e3   :  { %v928_v22 = vpop.permute.xlu0 %927 }
 0x3e4   :  { %3047 = vmatprep.subr.msk.mxu1 %vm363_vm0, %v928_v22 }
 0x3e7   :  { %v924_v23 = vpop.permute.xlu0 %923 }
 0x3e9   :  { %v3288_v25 = vpop.eup %3287 }
 0x3ea   :  { %v803_v28 = vmul.f32 %v3288_v25, %v3284_v14 }
 0x3eb   :  { %v920_v24 = vpop.permute.xlu0 %919 }
 0x3ed   :  { %v3290_v26 = vpop.eup %3289 }
 0x3ee   :  { %v802_v27 = vmul.f32 %v3290_v26, %v3286_v17 }
 0x3ef   :  { %v916_v29 = vpop.permute.xlu0 %915 }
 0x3f0   :  { %3044 = vmatprep.mubr.msk.f32.mxu1 %vm781_vm2, %v802_v27 }
 0x3f1   :  { %3045 = vmatmul.mubr.msk.f32.vlgmr.msra.gmra.mxu1 %vm781_vm2, %v803_v28 }
 0x3f2   :  { %3048 = vmatpush3.xpose.msk.msra.mxu1 %vm363_vm0, %v928_v22 }
 0x3f3   :  { %3049 = vmatprep.subr.msk.mxu1 %vm363_vm0, %v926_v30  ;;  %v910_v31 = vpop.permute.xlu0 %909 }
 0x3f4   :  { %3063 = vmatprep.mubr.msk.f32.mxu1 %vm363_vm0, %v910_v31 }
 0x3f6   :  { %3050 = vmatpush3.xpose.msk.msra.mxu1 %vm363_vm0, %v926_v30 }
 0x3f7   :  { %3051 = vmatprep.subr.msk.mxu1 %vm363_vm0, %v924_v23 }
 0x3fa   :  { %3052 = vmatpush3.xpose.msk.msra.mxu1 %vm363_vm0, %v924_v23  ;;  %v666_v23 = vld [vmem:[%s4066_s10] sm:$0xff] }
 0x3fb   :  { %3053 = vmatprep.subr.msk.mxu1 %vm363_vm0, %v922_v32 }
 0x3fe   :  { %3054 = vmatpush3.xpose.msk.msra.mxu1 %vm363_vm0, %v922_v32 }
 0x3ff   :  { %3055 = vmatprep.subr.msk.mxu1 %vm363_vm0, %v920_v24 }
 0x402   :  { %3056 = vmatpush3.xpose.msk.msra.mxu1 %vm363_vm0, %v920_v24 }
 0x403   :  { %3057 = vmatprep.subr.msk.mxu1 %vm363_vm0, %v918_v33 }
 0x406   :  { %3058 = vmatpush3.xpose.msk.msra.mxu1 %vm363_vm0, %v918_v33 }
 0x407   :  { %3059 = vmatprep.subr.msk.mxu1 %vm363_vm0, %v916_v29 }
 0x40a   :  { %3060 = vmatpush3.xpose.msk.msra.mxu1 %vm363_vm0, %v916_v29 }
 0x40b   :  { %3061 = vmatprep.subr.msk.mxu1 %vm363_vm0, %v914_v34 }
 0x40e   :  { %3062 = vmatpush3.xpose.msk.msra.mxu1 %vm363_vm0, %v914_v34 }
 0x411   :  { %3064 = vmatmul.mubr.msk.f32.vlgmr.msra.gmra.mxu1 %vm363_vm0, %v912_v35 }
 0x4b1   :  { %v3798_v36 = vpop.f32.mrf.mxu1 }
 0x4b3   :  { %v3800_v37 = vpop.f32.mrf.mxu1 }
 0x4d1   :  { %v3065_v38 = vpop.f32.mrf.mxu1 }
 0x4d2   :  { %v1025_v39 = vmul.f32 0.25, %v3065_v38 }
 0x4d3   :  { %v1015_v41 = vpop.f32.mrf.mxu1 }
 0x4d4   :  { %v1024_v43 = vmul.f32 0.25, %v1015_v41  ;;  %v1029_v44 = vsel %vm781_vm2, %v1025_v39, -inf }
 0x4d5   :  { %1030 = vmax.xlane.f32.xlu1 %v1029_v44 }
 0x4d6   :  { %v1026_v45 = vsel %vm781_vm2, %v1024_v43, -inf }
 0x4d7   :  { %1027 = vmax.xlane.f32.xlu0 %v1026_v45 }
 0x4e6   :  { %1062 = vrot.lane.b32.xlu1 %v3696_v51, %s3408_s26 }
 0x4ea   :  { %1058 = vrot.lane.b32.xlu1 %v3706_v54, %s3408_s26 }
 0x4ed   :  { %1060 = vrot.lane.b32.xlu0 %v3698_v53, %s3408_s26 }
 0x4ee   :  { %1056 = vrot.lane.b32.xlu1 %v3712_v55, %s3408_s26 }
 0x4f1   :  { %1054 = vrot.lane.b32.xlu0 %v3718_v56, %s3408_s26 }
 0x4f2   :  { %1052 = vrot.lane.b32.xlu1 %v3724_v57, %s3408_s26 }
 0x4f6   :  { %1048 = vrot.lane.b32.xlu1 %v3736_v59, %s3408_s26 }
 0x4fa   :  { %1331 = vrot.lane.b32.xlu1 %v3698_v53, %s3409_s24 }
 0x4fe   :  { %1327 = vrot.lane.b32.xlu1 %v3712_v55, %s3409_s24 }
 0x502   :  { %1323 = vrot.lane.b32.xlu1 %v3724_v57, %s3409_s24 }
 0x506   :  { %1319 = vrot.lane.b32.xlu1 %v3736_v59, %s3409_s24 }
 0x50a   :  { %1317 = vrot.lane.b32.xlu1 %v3687_v40, %s3409_s24 }
 0x55e   :  { %v1031_v46 = vpop.xlane.xlu1 %1030 }
 0x55f   :  { %v1033_v47 = vsub.f32 %v1025_v39, %v1031_v46 }
 0x560   :  { %v1028_v48 = vpop.xlane.xlu0 %1027 }
 0x561   :  { %v1036_v49 = vmul.f32 1.442695, %v1033_v47  ;;  %v1032_v50 = vsub.f32 %v1024_v43, %v1028_v48 }
 0x562   :  { %v1063_v52 = vpop.permute.xlu1 %1062 }
 0x563   :  { %3291 = vpow2.f32 %v1036_v49  ;;  %v1034_v60 = vmul.f32 1.442695, %v1032_v50  ;;  %3066 = vmatprep.subr.mxu0 %v1063_v52 }
 0x564   :  { %3067 = vmatpush3.msra.mxu0 %v1063_v52  ;;  %v1061_v61 = vpop.permute.xlu0 %1060 }
 0x565   :  { %3293 = vpow2.f32 %v1034_v60  ;;  %3068 = vmatprep.subr.mxu0 %v1061_v61 }
 0x566   :  { %v1059_v62 = vpop.permute.xlu1 %1058  ;;  %3069 = vmatpush3.msra.mxu0 %v1061_v61 }
 0x567   :  { %3070 = vmatprep.subr.mxu0 %v1059_v62 }
 0x568   :  { %3071 = vmatpush3.msra.mxu0 %v1059_v62  ;;  %v1055_v0 = vpop.permute.xlu0 %1054 }
 0x56a   :  { %v1057_v63 = vpop.permute.xlu1 %1056 }
 0x56b   :  { %3072 = vmatprep.subr.mxu0 %v1057_v63 }
 0x56c   :  { %3073 = vmatpush3.msra.mxu0 %v1057_v63 }
 0x56d   :  { %3074 = vmatprep.subr.mxu0 %v1055_v0 }
 0x56e   :  { %v1053_v1 = vpop.permute.xlu1 %1052  ;;  %3075 = vmatpush3.msra.mxu0 %v1055_v0 }
 0x56f   :  { %3076 = vmatprep.subr.mxu0 %v1053_v1 }
 0x570   :  { %v3292_v2 = vpop.eup %3291  ;;  %3077 = vmatpush3.msra.mxu0 %v1053_v1 }
 0x571   :  { %v1041_v3 = vsel %vm781_vm2, %v3292_v2, 0.0 }
 0x572   :  { %v3294_v4 = vpop.eup %3293  ;;  %1042 = vadd.xlane.f32.xlu0 %v1041_v3  ;;  %v1049_v9 = vpop.permute.xlu1 %1048 }
 0x573   :  { %v1038_v5 = vsel %vm781_vm2, %v3294_v4, 0.0 }
 0x576   :  { %1039 = vadd.xlane.f32.xlu0 %v1038_v5  ;;  %v1332_v25 = vpop.permute.xlu1 %1331 }
 0x57a   :  { %v1328_v26 = vpop.permute.xlu1 %1327 }
 0x57e   :  { %v1324_v27 = vpop.permute.xlu1 %1323 }
 0x582   :  { %v1320_v28 = vpop.permute.xlu1 %1319 }
 0x586   :  { %v1318_v29 = vpop.permute.xlu1 %1317 }
 0x58c   :  { %1050 = vrot.lane.b32.xlu0 %v3730_v58, %s3408_s26 }
 0x590   :  { %1333 = vrot.lane.b32.xlu0 %v3696_v51, %s3409_s24 }
 0x594   :  { %1329 = vrot.lane.b32.xlu0 %v3706_v54, %s3409_s24 }
 0x598   :  { %1325 = vrot.lane.b32.xlu0 %v3718_v56, %s3409_s24 }
 0x59c   :  { %1321 = vrot.lane.b32.xlu0 %v3730_v58, %s3409_s24 }
 0x5a0   :  { %1315 = vrot.lane.b32.xlu0 %v3689_v42, %s3409_s24 }
 0x5fb   :  { %v1043_v6 = vpop.xlane.xlu0 %1042 }
 0x5fc   :  { %3295 = vrcp.f32 %v1043_v6 }
 0x5ff   :  { %v1040_v7 = vpop.xlane.xlu0 %1039 }
 0x600   :  { %3297 = vrcp.f32 %v1040_v7  ;;  %v671_v7 = vld [vmem:[%s4066_s10 + $0x28] sm:$0xff] }
 0x603   :  { %v1051_v8 = vpop.permute.xlu0 %1050 }
 0x604   :  { %3078 = vmatprep.subr.mxu0 %v1051_v8 }
 0x605   :  { %3079 = vmatpush3.msra.mxu0 %v1051_v8 }
 0x606   :  { %3080 = vmatprep.subr.mxu0 %v1049_v9 }
 0x607   :  { %3081 = vmatpush3.msra.mxu0 %v1049_v9  ;;  %v1334_v17 = vpop.permute.xlu0 %1333 }
 0x608   :  { %3085 = vmatprep.subr.mxu0 %v669_v10 }
 0x609   :  { %v3296_v11 = vpop.eup %3295 }
 0x60a   :  { %v1047_v14 = vmul.f32 %v3296_v11, %v3292_v2 }
 0x60b   :  { %v1330_v18 = vpop.permute.xlu0 %1329 }
 0x60d   :  { %v3298_v12 = vpop.eup %3297 }
 0x60e   :  { %v1046_v13 = vmul.f32 %v3298_v12, %v3294_v4 }
 0x60f   :  { %v1326_v19 = vpop.permute.xlu0 %1325 }
 0x610   :  { %3082 = vmatprep.mubr.msk.f32.mxu0 %vm781_vm2, %v1046_v13 }
 0x611   :  { %3083 = vmatmul.mubr.msk.f32.vlgmr.msra.gmra.mxu0 %vm781_vm2, %v1047_v14 }
 0x612   :  { %3086 = vmatpush3.msra.mxu0 %v669_v10 }
 0x613   :  { %3087 = vmatprep.subr.mxu0 %v668_v15  ;;  %v1322_v21 = vpop.permute.xlu0 %1321 }
 0x614   :  { %3088 = vmatpush3.msra.mxu0 %v668_v15 }
 0x615   :  { %3092 = vmatprep.subr.mxu0 %v667_v16 }
 0x617   :  { %v1316_v24 = vpop.permute.xlu0 %1315 }
 0x6d1   :  { %v3084_v20 = vpop.f32.mrf.mxu0 }
 0x6d3   :  { %v1144_v22 = vpop.f32.mrf.mxu0 }
 0x6d4   :  { %3089 = vmatprep.mubr.msk.f32.mxu0 %vm363_vm0, %v1144_v22 }
 0x6d5   :  { %3090 = vmatmul.mubr.msk.f32.vlgmr.msra.gmra.mxu0 %vm363_vm0, %v3084_v20 }
 0x6d6   :  { %3093 = vmatpush3.msra.mxu0 %v667_v16  ;;  %3096 = vmatprep.mubr.msk.f32.mxu0 %vm363_vm0, %v3800_v37 }
 0x6d7   :  { %3094 = vmatprep.subr.mxu0 %v666_v23 }
 0x6d8   :  { %3095 = vmatpush3.msra.mxu0 %v666_v23 }
 0x6d9   :  { %3099 = vmatprep.subr.msk.mxu0 %vm363_vm0, %v1334_v17  ;;  %3097 = vmatmul.mubr.msk.f32.vlgmr.msra.gmra.mxu0 %vm363_vm0, %v3798_v36 }
 0x6da   :  { %3100 = vmatpush3.xpose.msk.msra.mxu0 %vm363_vm0, %v1334_v17  ;;  %3115 = vmatprep.mubr.msk.f32.mxu0 %vm363_vm0, %v1316_v24 }
 0x6db   :  { %3101 = vmatprep.subr.msk.mxu0 %vm363_vm0, %v1332_v25 }
 0x6de   :  { %3102 = vmatpush3.xpose.msk.msra.mxu0 %vm363_vm0, %v1332_v25 }
 0x6df   :  { %3103 = vmatprep.subr.msk.mxu0 %vm363_vm0, %v1330_v18 }
 0x6e2   :  { %3104 = vmatpush3.xpose.msk.msra.mxu0 %vm363_vm0, %v1330_v18 }
 0x6e3   :  { %3105 = vmatprep.subr.msk.mxu0 %vm363_vm0, %v1328_v26 }
 0x6e6   :  { %3106 = vmatpush3.xpose.msk.msra.mxu0 %vm363_vm0, %v1328_v26 }
 0x6e7   :  { %3107 = vmatprep.subr.msk.mxu0 %vm363_vm0, %v1326_v19 }
 0x6ea   :  { %3108 = vmatpush3.xpose.msk.msra.mxu0 %vm363_vm0, %v1326_v19 }
 0x6eb   :  { %3109 = vmatprep.subr.msk.mxu0 %vm363_vm0, %v1324_v27 }
 0x6ee   :  { %3110 = vmatpush3.xpose.msk.msra.mxu0 %vm363_vm0, %v1324_v27 }
 0x6ef   :  { %3111 = vmatprep.subr.msk.mxu0 %vm363_vm0, %v1322_v21 }
 0x6f2   :  { %3112 = vmatpush3.xpose.msk.msra.mxu0 %vm363_vm0, %v1322_v21 }
 0x6f3   :  { %3113 = vmatprep.subr.msk.mxu0 %vm363_vm0, %v1320_v28 }
 0x6f6   :  { %3114 = vmatpush3.xpose.msk.msra.mxu0 %vm363_vm0, %v1320_v28 }
 0x6f9   :  { %3116 = vmatmul.mubr.msk.f32.vlgmr.msra.gmra.mxu0 %vm363_vm0, %v1318_v29 }
 0x795   :  { %v3091_v30 = vpop.f32.mrf.mxu0 }
 0x797   :  { %v1225_v31 = vpop.f32.mrf.mxu0 }
 0x799   :  { %v3098_v32 = vpop.f32.mrf.mxu0 }
 0x79a   :  { %v3880_v33 = vadd.f32 %v3098_v32, %v3091_v30 }
 0x79b   :  { %v1306_v34 = vpop.f32.mrf.mxu0 }
 0x79c   :  { %v3882_v35 = vadd.f32 %v1306_v34, %v1225_v31 }
 0x7b9   :  { %v3117_v36 = vpop.f32.mrf.mxu0 }
 0x7ba   :  { %v1431_v37 = vmul.f32 0.25, %v3117_v36 }
 0x7bb   :  { %v1421_v38 = vpop.f32.mrf.mxu0 }
 0x7bc   :  { %v1430_v39 = vmul.f32 0.25, %v1421_v38  ;;  %v1435_v41 = vsel %vm781_vm2, %v1431_v37, -inf }
 0x7bd   :  { %1436 = vmax.xlane.f32.xlu1 %v1435_v41 }
 0x7be   :  { %v1432_v43 = vsel %vm781_vm2, %v1430_v39, -inf }
 0x7bf   :  { %1433 = vmax.xlane.f32.xlu0 %v1432_v43 }
 0x7ce   :  { %1468 = vrot.lane.b32.xlu1 %v3696_v51, %s3410_s3 }
 0x7d2   :  { %1464 = vrot.lane.b32.xlu1 %v3706_v54, %s3410_s3 }
 0x7d5   :  { %1466 = vrot.lane.b32.xlu0 %v3698_v53, %s3410_s3 }
 0x7d6   :  { %1462 = vrot.lane.b32.xlu1 %v3712_v55, %s3410_s3 }
 0x7d9   :  { %1460 = vrot.lane.b32.xlu0 %v3718_v56, %s3410_s3 }
 0x7da   :  { %1458 = vrot.lane.b32.xlu1 %v3724_v57, %s3410_s3 }
 0x7de   :  { %1454 = vrot.lane.b32.xlu1 %v3736_v59, %s3410_s3 }
 0x7e2   :  { %1658 = vrot.lane.b32.xlu1 %v3698_v53, %s3411_s18 }
 0x7e6   :  { %1654 = vrot.lane.b32.xlu1 %v3712_v55, %s3411_s18 }
 0x7ea   :  { %1650 = vrot.lane.b32.xlu1 %v3724_v57, %s3411_s18 }
 0x7ee   :  { %1646 = vrot.lane.b32.xlu1 %v3736_v59, %s3411_s18 }
 0x7f2   :  { %1644 = vrot.lane.b32.xlu1 %v3687_v40, %s3411_s18 }
 0x846   :  { %v1437_v44 = vpop.xlane.xlu1 %1436 }
 0x847   :  { %v1439_v45 = vsub.f32 %v1431_v37, %v1437_v44 }
 0x848   :  { %v1434_v46 = vpop.xlane.xlu0 %1433 }
 0x849   :  { %v1442_v47 = vmul.f32 1.442695, %v1439_v45  ;;  %v1438_v48 = vsub.f32 %v1430_v39, %v1434_v46 }
 0x84a   :  { %v1469_v49 = vpop.permute.xlu1 %1468 }
 0x84b   :  { %3299 = vpow2.f32 %v1442_v47  ;;  %v1440_v50 = vmul.f32 1.442695, %v1438_v48  ;;  %3118 = vmatprep.subr.mxu1 %v1469_v49 }
 0x84c   :  { %3119 = vmatpush3.msra.mxu1 %v1469_v49  ;;  %v1467_v52 = vpop.permute.xlu0 %1466 }
 0x84d   :  { %3301 = vpow2.f32 %v1440_v50  ;;  %3120 = vmatprep.subr.mxu1 %v1467_v52 }
 0x84e   :  { %v1465_v60 = vpop.permute.xlu1 %1464  ;;  %3121 = vmatpush3.msra.mxu1 %v1467_v52 }
 0x84f   :  { %3122 = vmatprep.subr.mxu1 %v1465_v60 }
 0x850   :  { %3123 = vmatpush3.msra.mxu1 %v1465_v60  ;;  %v1461_v40 = vpop.permute.xlu0 %1460 }
 0x852   :  { %v1463_v61 = vpop.permute.xlu1 %1462 }
 0x853   :  { %3124 = vmatprep.subr.mxu1 %v1463_v61 }
 0x854   :  { %3125 = vmatpush3.msra.mxu1 %v1463_v61  ;;  %v672_v61 = vld [vmem:[%s4066_s10 + $0x30] sm:$0xff] }
 0x855   :  { %3126 = vmatprep.subr.mxu1 %v1461_v40 }
 0x856   :  { %v1459_v62 = vpop.permute.xlu1 %1458  ;;  %3127 = vmatpush3.msra.mxu1 %v1461_v40 }
 0x857   :  { %3128 = vmatprep.subr.mxu1 %v1459_v62 }
 0x858   :  { %v3300_v63 = vpop.eup %3299  ;;  %3129 = vmatpush3.msra.mxu1 %v1459_v62 }
 0x859   :  { %v1447_v0 = vsel %vm781_vm2, %v3300_v63, 0.0 }
 0x85a   :  { %v3302_v1 = vpop.eup %3301  ;;  %1448 = vadd.xlane.f32.xlu0 %v1447_v0  ;;  %v1455_v6 = vpop.permute.xlu1 %1454 }
 0x85b   :  { %v1444_v2 = vsel %vm781_vm2, %v3302_v1, 0.0 }
 0x85e   :  { %1445 = vadd.xlane.f32.xlu0 %v1444_v2  ;;  %v1659_v19 = vpop.permute.xlu1 %1658 }
 0x862   :  { %v1655_v20 = vpop.permute.xlu1 %1654 }
 0x866   :  { %v1651_v21 = vpop.permute.xlu1 %1650 }
 0x86a   :  { %v1647_v22 = vpop.permute.xlu1 %1646 }
 0x86e   :  { %v1645_v23 = vpop.permute.xlu1 %1644 }
 0x874   :  { %1456 = vrot.lane.b32.xlu0 %v3730_v58, %s3410_s3  ;;  %s2607_s3 = sshll.u32 %s3416_s6, 4  ;;  %s2608_s3 = int_to_ptr.vmem [resolvable:$true] %s2607_s3 }
 0x878   :  { %1660 = vrot.lane.b32.xlu0 %v3696_v51, %s3411_s18 }
 0x87c   :  { %1656 = vrot.lane.b32.xlu0 %v3706_v54, %s3411_s18 }
 0x880   :  { %1652 = vrot.lane.b32.xlu0 %v3718_v56, %s3411_s18 }
 0x884   :  { %1648 = vrot.lane.b32.xlu0 %v3730_v58, %s3411_s18 }
 0x888   :  { %1642 = vrot.lane.b32.xlu0 %v3689_v42, %s3411_s18  ;;  %v670_v42 = vld [vmem:[%s4066_s10 + $0x20] sm:$0xff]  ;;  %s3319_s18 = scalar_lea.vmem %s2620_s30, 256 }
 0x889   :  { %p3320_p0 = scmp.ne.s32.totalorder %s2620_s30, %s3319_s18  ;;  %p3325_p2 = scmp.lt.s32.totalorder %s3319_s18, %s3319_s18 }
 0x88b   :  { %p3326_p3 = por %p3325_p2, %p3324_p1 }
 0x88d   :  { %p3327_p4 = pnand %p3326_p3, %p3320_p0 }
 0x8e3   :  { %v1449_v3 = vpop.xlane.xlu0 %1448 }
 0x8e4   :  { %3303 = vrcp.f32 %v1449_v3 }
 0x8e7   :  { %v1446_v4 = vpop.xlane.xlu0 %1445 }
 0x8e8   :  { %3305 = vrcp.f32 %v1446_v4 }
 0x8eb   :  { %v1457_v5 = vpop.permute.xlu0 %1456 }
 0x8ec   :  { %3130 = vmatprep.subr.mxu1 %v1457_v5 }
 0x8ed   :  { %3131 = vmatpush3.msra.mxu1 %v1457_v5 }
 0x8ee   :  { %3132 = vmatprep.subr.mxu1 %v1455_v6 }
 0x8ef   :  { %3133 = vmatpush3.msra.mxu1 %v1455_v6  ;;  %v1661_v12 = vpop.permute.xlu0 %1660 }
 0x8f0   :  { %3137 = vmatprep.subr.mxu1 %v671_v7 }
 0x8f1   :  { %v3304_v8 = vpop.eup %3303 }
 0x8f2   :  { %v1453_v11 = vmul.f32 %v3304_v8, %v3300_v63  ;;  %v3413_v63 = vmov 0.0   ;;  %v2750_v8 = vld [vmem:[%s4068_s12 + $0x4] sm:$0xf] }
 0x8f3   :  { %v1657_v13 = vpop.permute.xlu0 %1656 }
 0x8f5   :  { %v3306_v9 = vpop.eup %3305 }
 0x8f6   :  { %v1452_v10 = vmul.f32 %v3306_v9, %v3302_v1  ;;  %v2748_v1 = vld [vmem:[%s4067_s11] ss:$0 sm:$0xff] }
 0x8f7   :  { %v1653_v14 = vpop.permute.xlu0 %1652 }
 0x8f8   :  { %3134 = vmatprep.mubr.msk.f32.mxu1 %vm781_vm2, %v1452_v10 }
 0x8f9   :  { %3135 = vmatmul.mubr.msk.f32.vlgmr.msra.gmra.mxu1 %vm781_vm2, %v1453_v11 }
 0x8fa   :  { %3138 = vmatpush3.msra.mxu1 %v671_v7  ;;  %v1980_v7 = vld [vmem:[%s4068_s12] sm:$0xf] }
 0x8fb   :  { %3139 = vmatprep.subr.mxu1 %v670_v42  ;;  %v1649_v15 = vpop.permute.xlu0 %1648 }
 0x8fc   :  { %3140 = vmatpush3.msra.mxu1 %v670_v42 }
 0x8fd   :  { %3144 = vmatprep.subr.msk.mxu1 %vm363_vm0, %v1661_v12 }
 0x8ff   :  { %v1643_v18 = vpop.permute.xlu0 %1642 }
 0x9b9   :  { %v3136_v16 = vpop.f32.mrf.mxu1 }
 0x9bb   :  { %v1550_v17 = vpop.f32.mrf.mxu1 }
 0x9bc   :  { %3141 = vmatprep.mubr.msk.f32.mxu1 %vm363_vm0, %v1550_v17 }
 0x9bd   :  { %3142 = vmatmul.mubr.msk.f32.vlgmr.msra.gmra.mxu1 %vm363_vm0, %v3136_v16 }
 0x9be   :  { %3145 = vmatpush3.xpose.msk.msra.mxu1 %vm363_vm0, %v1661_v12  ;;  %3160 = vmatprep.mubr.msk.f32.mxu1 %vm363_vm0, %v1643_v18  ;;  %v2752_v12 = vld [vmem:[%s4068_s12 + $0x8] sm:$0xf] }
 0x9bf   :  { %3146 = vmatprep.subr.msk.mxu1 %vm363_vm0, %v1659_v19 }
 0x9c2   :  { %3147 = vmatpush3.xpose.msk.msra.mxu1 %vm363_vm0, %v1659_v19 }
 0x9c3   :  { %3148 = vmatprep.subr.msk.mxu1 %vm363_vm0, %v1657_v13 }
 0x9c6   :  { %3149 = vmatpush3.xpose.msk.msra.mxu1 %vm363_vm0, %v1657_v13  ;;  %v2754_v13 = vld [vmem:[%s4068_s12 + $0xc] sm:$0xf] }
 0x9c7   :  { %3150 = vmatprep.subr.msk.mxu1 %vm363_vm0, %v1655_v20 }
 0x9ca   :  { %3151 = vmatpush3.xpose.msk.msra.mxu1 %vm363_vm0, %v1655_v20 }
 0x9cb   :  { %3152 = vmatprep.subr.msk.mxu1 %vm363_vm0, %v1653_v14 }
 0x9ce   :  { %3153 = vmatpush3.xpose.msk.msra.mxu1 %vm363_vm0, %v1653_v14 }
 0x9cf   :  { %3154 = vmatprep.subr.msk.mxu1 %vm363_vm0, %v1651_v21 }
 0x9d2   :  { %3155 = vmatpush3.xpose.msk.msra.mxu1 %vm363_vm0, %v1651_v21 }
 0x9d3   :  { %3156 = vmatprep.subr.msk.mxu1 %vm363_vm0, %v1649_v15 }
 0x9d6   :  { %3157 = vmatpush3.xpose.msk.msra.mxu1 %vm363_vm0, %v1649_v15 }
 0x9d7   :  { %3158 = vmatprep.subr.msk.mxu1 %vm363_vm0, %v1647_v22 }
 0x9da   :  { %3159 = vmatpush3.xpose.msk.msra.mxu1 %vm363_vm0, %v1647_v22 }
 0x9db   :  { %3203 = vmatprep.subr.mxu1 %v3413_v63 }
 0x9dd   :  { %3161 = vmatmul.mubr.msk.f32.vlgmr.msra.gmra.mxu1 %vm363_vm0, %v1645_v23  ;;  %v2561_v23 = vlaneseq }
 0x9de   :  { %3205 = vmatprep.mubr.msk.f32.mxu1 %vm3414_vm3, %v3413_v63 }
 0xa7d   :  { %v3143_v24 = vpop.f32.mrf.mxu1 }
 0xa7e   :  { %v3953_v25 = vadd.f32 %v3143_v24, %v3880_v33  ;;  %v2562_v24 = vshrl.u32 %v2561_v23, 7 }
 0xa7f   :  { %v1631_v26 = vpop.f32.mrf.mxu1 }
 0xa80   :  { %v3956_v27 = vadd.f32 %v1631_v26, %v3882_v35 }
 0xa9d   :  { %v3162_v28 = vpop.f32.mrf.mxu1 }
 0xa9e   :  { %v1758_v29 = vmul.f32 0.25, %v3162_v28 }
 0xa9f   :  { %v1748_v30 = vpop.f32.mrf.mxu1 }
 0xaa0   :  { %v1757_v31 = vmul.f32 0.25, %v1748_v30  ;;  %v1762_v32 = vsel %vm781_vm2, %v1758_v29, -inf }
 0xaa1   :  { %1763 = vmax.xlane.f32.xlu1 %v1762_v32 }
 0xaa2   :  { %v1759_v34 = vsel %vm781_vm2, %v1757_v31, -inf }
 0xaa3   :  { %1760 = vmax.xlane.f32.xlu0 %v1759_v34 }
 0xab2   :  { %1795 = vrot.lane.b32.xlu1 %v3696_v51, %s3412_s2 }
 0xab6   :  { %1791 = vrot.lane.b32.xlu1 %v3706_v54, %s3412_s2 }
 0xab9   :  { %1793 = vrot.lane.b32.xlu0 %v3698_v53, %s3412_s2 }
 0xaba   :  { %1789 = vrot.lane.b32.xlu1 %v3712_v55, %s3412_s2 }
 0xabd   :  { %1787 = vrot.lane.b32.xlu0 %v3718_v56, %s3412_s2 }
 0xabe   :  { %1785 = vrot.lane.b32.xlu1 %v3724_v57, %s3412_s2 }
 0xac2   :  { %1781 = vrot.lane.b32.xlu1 %v3736_v59, %s3412_s2 }
 0xb2a   :  { %v1764_v33 = vpop.xlane.xlu1 %1763 }
 0xb2b   :  { %v1766_v51 = vsub.f32 %v1758_v29, %v1764_v33 }
 0xb2c   :  { %v1761_v35 = vpop.xlane.xlu0 %1760 }
 0xb2d   :  { %v1769_v36 = vmul.f32 1.442695, %v1766_v51  ;;  %v1765_v54 = vsub.f32 %v1757_v31, %v1761_v35 }
 0xb2e   :  { %v1796_v37 = vpop.permute.xlu1 %1795 }
 0xb2f   :  { %3307 = vpow2.f32 %v1769_v36  ;;  %v1767_v53 = vmul.f32 1.442695, %v1765_v54  ;;  %3163 = vmatprep.subr.mxu0 %v1796_v37 }
 0xb30   :  { %3164 = vmatpush3.msra.mxu0 %v1796_v37  ;;  %v1794_v55 = vpop.permute.xlu0 %1793 }
 0xb31   :  { %3309 = vpow2.f32 %v1767_v53  ;;  %3165 = vmatprep.subr.mxu0 %v1794_v55 }
 0xb32   :  { %v1792_v56 = vpop.permute.xlu1 %1791  ;;  %3166 = vmatpush3.msra.mxu0 %v1794_v55 }
 0xb33   :  { %3167 = vmatprep.subr.mxu0 %v1792_v56 }
 0xb34   :  { %3168 = vmatpush3.msra.mxu0 %v1792_v56  ;;  %v1788_v59 = vpop.permute.xlu0 %1787  ;;  %v2584_v56 = vld [vmem:[%s4069_s13] sm:$0x3] }
 0xb36   :  { %v1790_v57 = vpop.permute.xlu1 %1789 }
 0xb37   :  { %3169 = vmatprep.subr.mxu0 %v1790_v57 }
 0xb38   :  { %3170 = vmatpush3.msra.mxu0 %v1790_v57 }
 0xb39   :  { %3171 = vmatprep.subr.mxu0 %v1788_v59 }
 0xb3a   :  { %v1786_v38 = vpop.permute.xlu1 %1785  ;;  %3172 = vmatpush3.msra.mxu0 %v1788_v59 }
 0xb3b   :  { %3173 = vmatprep.subr.mxu0 %v1786_v38 }
 0xb3c   :  { %v3308_v39 = vpop.eup %3307  ;;  %3174 = vmatpush3.msra.mxu0 %v1786_v38  ;;  %v2585_v38 = vunpack.c.l.bf16 %v2584_v56 }
 0xb3d   :  { %v1774_v41 = vsel %vm781_vm2, %v3308_v39, 0.0 }
 0xb3e   :  { %v3310_v43 = vpop.eup %3309  ;;  %1775 = vadd.xlane.f32.xlu0 %v1774_v41  ;;  %v1782_v48 = vpop.permute.xlu1 %1781 }
 0xb3f   :  { %v1771_v44 = vsel %vm781_vm2, %v3310_v43, 0.0 }
 0xb42   :  { %1772 = vadd.xlane.f32.xlu0 %v1771_v44 }
 0xb58   :  { %1783 = vrot.lane.b32.xlu0 %v3730_v58, %s3412_s2  ;;  %v673_v58 = vld [vmem:[%s4066_s10 + $0x38] sm:$0xff] }
 0xbc7   :  { %v1776_v45 = vpop.xlane.xlu0 %1775 }
 0xbc8   :  { %3311 = vrcp.f32 %v1776_v45 }
 0xbcb   :  { %v1773_v46 = vpop.xlane.xlu0 %1772 }
 0xbcc   :  { %3313 = vrcp.f32 %v1773_v46 }
 0xbcf   :  { %v1784_v47 = vpop.permute.xlu0 %1783 }
 0xbd0   :  { %3175 = vmatprep.subr.mxu0 %v1784_v47 }
 0xbd1   :  { %3176 = vmatpush3.msra.mxu0 %v1784_v47 }
 0xbd2   :  { %3177 = vmatprep.subr.mxu0 %v1782_v48 }
 0xbd3   :  { %3178 = vmatpush3.msra.mxu0 %v1782_v48 }
 0xbd4   :  { %3182 = vmatprep.subr.mxu0 %v673_v58 }
 0xbd5   :  { %v3312_v49 = vpop.eup %3311 }
 0xbd6   :  { %v1780_v60 = vmul.f32 %v3312_v49, %v3308_v39 }
 0xbd9   :  { %v3314_v50 = vpop.eup %3313 }
 0xbda   :  { %v1779_v52 = vmul.f32 %v3314_v50, %v3310_v43 }
 0xbdc   :  { %3179 = vmatprep.mubr.msk.f32.mxu0 %vm781_vm2, %v1779_v52 }
 0xbdd   :  { %3180 = vmatmul.mubr.msk.f32.vlgmr.msra.gmra.mxu0 %vm781_vm2, %v1780_v60 }
 0xbde   :  { %3183 = vmatpush3.msra.mxu0 %v673_v58 }
 0xbdf   :  { %3184 = vmatprep.subr.mxu0 %v672_v61 }
 0xbe0   :  { %3185 = vmatpush3.msra.mxu0 %v672_v61 }
 0xbe1   :  { %3189 = vmatprep.subr.mxu0 %v3413_v63 }
 0xc9d   :  { %v3181_v40 = vpop.f32.mrf.mxu0 }
 0xc9f   :  { %v1877_v62 = vpop.f32.mrf.mxu0 }
 0xca0   :  { %3186 = vmatprep.mubr.msk.f32.mxu0 %vm363_vm0, %v1877_v62 }
 0xca1   :  { %3187 = vmatmul.mubr.msk.f32.vlgmr.msra.gmra.mxu0 %vm363_vm0, %v3181_v40 }
 0xca2   :  { %3193 = vmatprep.mubr.msk.f32.mxu0 %vm3414_vm3, %v3413_v63 }
 0xd61   :  { %v3188_v0 = vpop.f32.mrf.mxu0 }
 0xd62   :  { %v1968_v2 = vadd.f32 %v3188_v0, %v3953_v25  ;;  %v2564_v25 = vand.u32 127, %v2561_v23 }
 0xd63   :  { %v1958_v3 = vpop.f32.mrf.mxu0 }
 0xd64   :  { %v1977_v4 = vadd.f32 %v2748_v1, %v1968_v2  ;;  %v1967_v5 = vadd.f32 %v1958_v3, %v3956_v27  ;;  %vm2565_vm4 = vcmp.eq.s32.totalorder %v2562_v24, %v2564_v25 }
 0xd65   :  { %v2756_v30 = vsel %vm2565_vm4, 1.0, %v3413_v63 }
 0xd66   :  { %1979 = vst [vmem:[#allocation4 + $0x8] sm:$0xff] %v1977_v4  ;;  %v1976_v6 = vadd.f32 %v2748_v1, %v1967_v5  ;;  %3190 = vmatpush3.msra.mxu0 %v1977_v4 }
 0xd67   :  { %3191 = vmatprep.subr.mxu0 %v3413_v63 }
 0xd68   :  { %1978 = vst [vmem:[#allocation4] sm:$0xff] %v1976_v6  ;;  %3192 = vmatpush3.msra.mxu0 %v1976_v6 }
 0xd69   :  { %3194 = vmatmul.mubr.msk.f32.vlgmr.msra.gmra.mxu0 %vm363_vm0, %v1980_v7  ;;  %3196 = vmatprep.subr.mxu0 %v3413_v63 }
 0xd6a   :  { %3197 = vmatpush3.msra.mxu0 %v1977_v4  ;;  %3200 = vmatprep.mubr.msk.f32.mxu0 %vm3414_vm3, %v3413_v63 }
 0xd6b   :  { %3198 = vmatprep.subr.mxu0 %v3413_v63 }
 0xd6c   :  { %3199 = vmatpush3.msra.mxu0 %v1976_v6 }
 0xd6d   :  { %3201 = vmatmul.mubr.msk.f32.vlgmr.msra.gmra.mxu0 %vm363_vm0, %v2750_v8  ;;  %3208 = vmatprep.subr.mxu0 %v3413_v63 }
 0xd6e   :  { %3210 = vmatprep.mubr.msk.f32.mxu0 %vm3414_vm3, %v3413_v63 }
 0xe29   :  { %v2050_v9 = vpop.f32.mrf.mxu0 }
 0xe2a   :  { %3209 = vmatpush3.xpose.msra.mxu0 %v2050_v9 }
 0xe2b   :  { %v3195_v10 = vpop.f32.mrf.mxu0  ;;  %3220 = vmatprep.subr.mxu0 %v3413_v63 }
 0xe2d   :  { %v2125_v11 = vpop.f32.mrf.mxu0  ;;  %3211 = vmatmul.mubr.f32.vlgmr.msra.gmra.mxu0 %v2050_v9 }
 0xe2e   :  { %3204 = vmatpush3.xpose.msra.mxu1 %v2125_v11  ;;  %3222 = vmatprep.mubr.msk.f32.mxu0 %vm3414_vm3, %v3413_v63 }
 0xe2f   :  { %v3202_v42 = vpop.f32.mrf.mxu0  ;;  %3213 = vmatprep.subr.mxu1 %v3413_v63 }
 0xe31   :  { %3206 = vmatmul.mubr.f32.vlgmr.msra.gmra.mxu1 %v2125_v11 }
 0xe32   :  { %3214 = vmatpush3.msra.mxu1 %v1977_v4  ;;  %3217 = vmatprep.mubr.msk.f32.mxu1 %vm3414_vm3, %v3413_v63 }
 0xe33   :  { %3215 = vmatprep.subr.mxu1 %v3413_v63 }
 0xe34   :  { %3216 = vmatpush3.msra.mxu1 %v1976_v6 }
 0xe35   :  { %3218 = vmatmul.mubr.msk.f32.vlgmr.msra.gmra.mxu1 %vm363_vm0, %v2752_v12  ;;  %3225 = vmatprep.subr.mxu1 %v3413_v63 }
 0xe36   :  { %3226 = vmatpush3.msra.mxu1 %v1977_v4  ;;  %3229 = vmatprep.mubr.msk.f32.mxu1 %vm3414_vm3, %v3413_v63 }
 0xe37   :  { %3227 = vmatprep.subr.mxu1 %v3413_v63 }
 0xe38   :  { %3228 = vmatpush3.msra.mxu1 %v1976_v6 }
 0xe39   :  { %3230 = vmatmul.mubr.msk.f32.vlgmr.msra.gmra.mxu1 %vm363_vm0, %v2754_v13 }
 0xeed   :  { %v2265_v14 = vpop.f32.mrf.mxu0 }
 0xeef   :  { %v3212_v15 = vpop.f32.mrf.mxu0 }
 0xef1   :  { %v2195_v16 = vpop.f32.mrf.mxu1 }
 0xef2   :  { %v2266_v17 = vadd.f32 %v2265_v14, %v2195_v16 }
 0xef3   :  { %v3207_v18 = vpop.f32.mrf.mxu1 }
 0xef5   :  { %v2340_v19 = vpop.f32.mrf.mxu1 }
 0xef6   :  { %3221 = vmatpush3.xpose.msra.mxu0 %v2340_v19 }
 0xef7   :  { %v3219_v20 = vpop.f32.mrf.mxu1  ;;  %3232 = vmatprep.subr.mxu0 %v3413_v63 }
 0xef9   :  { %3223 = vmatmul.mubr.f32.vlgmr.msra.gmra.mxu0 %v2340_v19  ;;  %v2486_v21 = vpop.f32.mrf.mxu1 }
 0xefa   :  { %3233 = vmatpush3.xpose.msra.mxu0 %v2486_v21  ;;  %3234 = vmatprep.mubr.msk.f32.mxu0 %vm3414_vm3, %v3413_v63 }
 0xefb   :  { %v3231_v22 = vpop.f32.mrf.mxu1 }
 0xefd   :  { %3235 = vmatmul.mubr.f32.vlgmr.msra.gmra.mxu0 %v2486_v21 }
 0xfb9   :  { %v2410_v26 = vpop.f32.mrf.mxu0 }
 0xfba   :  { %v2414_v28 = vadd.f32 %v2410_v26, %v2266_v17 }
 0xfbb   :  { %v3224_v27 = vpop.f32.mrf.mxu0 }
 0xfbd   :  { %v2556_v29 = vpop.f32.mrf.mxu0 }
 0xfbe   :  { %v2560_v31 = vadd.f32 %v2556_v29, %v2414_v28 }
 0xfbf   :  { %v3236_v32 = vpop.f32.mrf.mxu0 }
 0xfc0   :  { %v2568_v34 = vmul.f32 %v2756_v30, %v2560_v31 }
 0xfc2   :  { %v2570_v33 = vsel %vm2569_vm5, %v2568_v34, 0.0 }
 0xfc3   :  { %2571 = vadd.xlane.f32.xlu0 %v2570_v33  ;;  %v2573_v51 = vrot.slane %v2570_v33, 4 }
 0xfc5   :  { %v2574_v35 = vadd.f32 %v2573_v51, %v2570_v33 }
 0xfc7   :  { %v2575_v36 = vrot.slane %v2574_v35, 2 }
 0xfc9   :  { %v2576_v54 = vadd.f32 %v2575_v36, %v2574_v35 }
 0xfcb   :  { %v2577_v37 = vrot.slane %v2576_v54, 1 }
 0xfcd   :  { %v2578_v53 = vadd.f32 %v2577_v37, %v2576_v54 }
0x104c   :  { %v2572_v55 = vpop.xlane.xlu0 %2571 }
0x104d   :  { %3315 = vrsqrt.f32 %v2572_v55 }
0x104e   :  { %3317 = vrsqrt.f32 %v2578_v53 }
0x105a   :  { %v3316_v57 = vpop.eup %3315 }
0x105b   :  { %v2580_v59 = vmul.f32 %v3316_v57, %v2560_v31  ;;  %v3318_v39 = vpop.eup %3317 }
0x105d   :  { %v2582_v41 = vmul.f32 %v3318_v39, %v2580_v59 }
0x105f   :  { %v2586_v43 = vsub.f32 %v2582_v41, %v2585_v38  ;;  %2583 = vst.msk [vmem:[#allocation6] sm:$0xf] %vm2569_vm5, %v2582_v41 }
0x1061   :  { %v2587_v44 = vmul.f32 %v2586_v43, %v2586_v43 }
0x1063   :  { %v2588_v45 = vsel %vm2569_vm5, %v2587_v44, 0.0 }
0x1064   :  { %2589 = vadd.xlane.f32.xlu1 %v2588_v45 }
0x1065   :  { %3330 = shalt.err (!%p3327_p4)
}
0x1066   :  { %s3417_s13 = smov 128   ;;  %s3418_s5 = smov 8  }
0x1067   :  { %2625 = dma.vmem_to_hbm [thread:$0]  %s2620_s30, 256, %s4071_s15, [#allocation5], %s3417_s13, %s3417_s13, %s3418_s5  }
0x1068   :  { %s3339_s20 = scalar_lea.vmem %s2608_s3, 1024  ;;  %p3344_p6 = scmp.lt.s32.totalorder %s2608_s3, %s2608_s3 }
0x1069   :  { %p3340_p5 = scmp.ne.s32.totalorder %s2608_s3, %s3339_s20  ;;  %p3345_p7 = scmp.lt.s32.totalorder %s3339_s20, %s3339_s20 }
0x106b   :  { %p3346_p8 = por %p3345_p7, %p3344_p6 }
0x106d   :  { %p3347_p9 = pnand %p3346_p8, %p3340_p5 }
0x106f   :  { %3350 = shalt.err (!%p3347_p9)
}
0x1070   :  { %2613 = dma.vmem_to_hbm [thread:$0]  %s2608_s3, 1024, %s4070_s14, [#allocation3], %s3417_s13, %s3417_s13, %s3418_s5  }
0x1071   :  { %s3419_s21 = smov [#allocation6]  }
0x1072   :  { %s2632_s22 = sshll.u32 %s3419_s21, 4  ;;  %s2633_s22 = int_to_ptr.vmem [resolvable:$true] %s2632_s22 }
0x1073   :  { %s3359_s23 = scalar_lea.vmem %s2633_s22, 64  ;;  %p3364_p11 = scmp.lt.s32.totalorder %s2633_s22, %s2633_s22 }
0x1074   :  { %p3360_p10 = scmp.ne.s32.totalorder %s2633_s22, %s3359_s23  ;;  %p3365_p12 = scmp.lt.s32.totalorder %s3359_s23, %s3359_s23 }
0x1076   :  { %p3366_p13 = por %p3365_p12, %p3364_p11 }
0x1078   :  { %p3367_p0 = pnand %p3366_p13, %p3360_p10 }
0x107a   :  { %3370 = shalt.err (!%p3367_p0)
}
0x107b   :  { %2635 = dma.vmem_to_hbm [thread:$0]  %s2633_s22, 64, %s4072_s16, [#allocation5]   ;;  %vm2591_vm6 = vcmask 1043456   ;;  %vm2600_vm7 = vcmask 0  }
0x107c   :  { %s3420_s14 = smov [#allocation7]  }
0x107d   :  { %s2642_s7 = sshll.u32 %s3420_s14, 4  ;;  %s2643_s7 = int_to_ptr.vmem [resolvable:$true] %s2642_s7 }
0x107e   :  { %s3379_s9 = scalar_lea.vmem %s2643_s7, 16  ;;  %s3383_s26 = scalar_lea.vmem %s2643_s7, 32 }
0x107f   :  { %p3380_p1 = scmp.ne.s32.totalorder %s2643_s7, %s3379_s9  ;;  %p3384_p2 = scmp.lt.s32.totalorder %s2643_s7, %s2643_s7 }
0x1080   :  { %p3385_p3 = scmp.lt.s32.totalorder %s3383_s26, %s3379_s9 }
0x1082   :  { %p3386_p4 = por %p3385_p3, %p3384_p2 }
0x1084   :  { %p3387_p5 = pnand %p3386_p4, %p3380_p1 }
0x10ed   :  { %v2590_v46 = vpop.xlane.xlu1 %2589 }
0x10ee   :  { %v2592_v47 = vsel %vm2591_vm6, %v2590_v46, 0.0 }
0x10ef   :  { %v2593_v48 = vrot.slane %v2592_v47, 4 }
0x10f1   :  { %v2594_v49 = vadd.f32 %v2593_v48, %v2592_v47 }
0x10f3   :  { %v2595_v50 = vrot.slane %v2594_v49, 2 }
0x10f5   :  { %v2596_v52 = vadd.f32 %v2595_v50, %v2594_v49 }
0x10f7   :  { %v2597_v60 = vrot.slane %v2596_v52, 1 }
0x10f9   :  { %v2598_v58 = vadd.f32 %v2597_v60, %v2596_v52 }
0x10fb   :  { %v2599_v61 = vmul.f32 0.0625, %v2598_v58 }
0x10fd   :  { %2601 = vst.msk [vmem:[#allocation7] sm:$0x1] %vm2600_vm7, %v2599_v61 }
0x10fe   :  { %3390 = shalt.err (!%p3387_p5)
}
0x10ff   :  { %2645 = dma.vmem_to_hbm [thread:$0]  %s2643_s7, 16, %s4073_s17, [#allocation8]  }
0x1100   :  { %3399 = dma.done.wait [#allocation3], 1024  }
0x1101   :  { %3400 = vsyncadd [#allocation3], 4294966272 }
0x1102   :  { %3401 = dma.done.wait [#allocation5], 320  }
0x1103   :  { %3402 = vsyncadd [#allocation5], 4294966976 }
0x1104   :  { %3403 = dma.done.wait [#allocation8], 16  }
0x1105   :  { %3404 = vsyncadd [#allocation8], 4294967280 }
0x1106   :  { %2658 = vsyncpa [#allocation3], 1 }
0x1107   :  { %2659 = vsyncpa [#allocation5], 1 }
0x1108   :  { %2660 = vsyncpa [#allocation8], 1 }

</bundles_post_ra>
